<compile_context>
chip_gen: v7x
topology: tpu7x:2x2x1
jax: 0.10.0
libtpu: 0.0.40
codegen_flags: <defaults>
</compile_context>

<pallas_src>
import jax
import jax.numpy as jnp
from jax.experimental import pallas as pl
from jax.experimental.pallas import tpu as pltpu


def _mlp_proj_kernel(x_ref, w_ref, b_ref, o_ref):
    """One (batch, token-tile) grid step of  out = x^T @ W^T + b.

    x_ref: (1, C, tn)  channel-major slab, DMA'd straight from the NCHW buffer
    w_ref: (C, E)      full weight (grid-invariant, resident in VMEM)
    b_ref: (1, E)      bias (kept f32)
    o_ref: (1, tn, E)  token-major output tile (lane axis = E)
    """
    x = x_ref[0]                                       # (C, tn)
    # Contract the channel axis of both operands -> (tn, E).  The channel
    # "transpose" happens as part of the MXU feed in VMEM, never in HBM.
    acc = jax.lax.dot_general(
        x, w_ref[...],
        dimension_numbers=(((0,), (0,)), ((), ())),
        preferred_element_type=jnp.float32,
    )
    o_ref[0] = (acc + b_ref[...]).astype(o_ref.dtype)


def _vmem_limit_and_budget():
    """(vmem_limit_bytes, tiling budget) -- generation-aware, conservative default."""
    try:
        cap = pltpu.get_tpu_info().vmem_capacity_bytes
    except Exception:
        cap = None
    if cap is not None and cap > 64 * 1024 * 1024:      # v5e / v6e: 128 MiB physical
        return 64 * 1024 * 1024, 48 * 1024 * 1024
    return 32 * 1024 * 1024, 24 * 1024 * 1024           # v7x (64 MiB/TC) or unknown


def _pick_token_tile(hw, c, e, in_item, out_item, w_item, budget, target=2048):
    """Largest lane-aligned token tile whose pipelined working set fits the budget."""
    fixed = 2 * (c * e + e) * w_item      # weight + bias, counted double-buffered (conservative)
    tn = min(target, hw)
    while tn > 256 and fixed + 2 * tn * (c * in_item + e * out_item) > budget:
        tn //= 2
    if tn >= hw:
        return hw                          # full-extent block is always legal
    return max(128, (tn // 128) * 128)     # keep the lane axis 128-aligned


def mlp_forward(x_nchw, weight, bias, *, token_tile=2048, out_dtype=None):
    """x_nchw: (B, C, H, W); weight: (E, C) [torch nn.Linear layout]; bias: (E,).

    Returns (B, H*W, E) in `out_dtype` (default: x's dtype).  For a genuinely
    cheaper bf16 path, hand x in already as bf16 from the producer; this wrapper
    deliberately never casts x (that would add an extra HBM pass).
    """
    B, C, H, W = x_nchw.shape
    E = weight.shape[0]
    HW = H * W
    out_dtype = jnp.dtype(out_dtype) if out_dtype is not None else x_nchw.dtype

    # Free view (contiguous collapse of trailing dims) -- no HBM pass, unlike an
    # explicit flatten(2).transpose(1, 2) which rewrites all of x.
    x3d = x_nchw.reshape(B, C, HW)
    w_t = weight.T.astype(x3d.dtype)              # (C, E); small -> cheap cast
    b2d = bias.reshape(1, E).astype(jnp.float32)

    in_item = jnp.dtype(x3d.dtype).itemsize
    out_item = jnp.dtype(out_dtype).itemsize
    w_item = jnp.dtype(w_t.dtype).itemsize
    vmem_limit, vmem_budget = _vmem_limit_and_budget()
    tn = _pick_token_tile(HW, C, E, in_item, out_item, w_item, vmem_budget,
                          target=token_tile)

    # v7x megacore balance: when B is odd, nudge the token-tile count even so the
    # (batch x tile) grid splits evenly across both TensorCores.
    if B % 2 == 1 and HW >= 256:
        n_tiles = pl.cdiv(HW, tn)
        if n_tiles % 2 == 1 and n_tiles < 8:
            cand = max(128, ((-(-HW // (n_tiles + 1)) + 127) // 128) * 128)
            if cand <= tn and pl.cdiv(HW, cand) % 2 == 0:
                tn = cand
    n_token_tiles = pl.cdiv(HW, tn)
    # NOTE: a ragged last tile feeds Pallas-padded (undefined) rows into the
    # matmul; the corresponding output rows are masked on write-back, so results
    # are correct (benign, but worth knowing for NaN-trapping/debug runs).

    cost = pl.CostEstimate(
        flops=2 * B * HW * C * E,
        transcendentals=0,
        bytes_accessed=int(x3d.size) * in_item + int(w_t.size) * w_item
                       + int(b2d.size) * 4 + B * HW * E * out_item,
    )

    def call(single_buffer_invariants):
        inv = {"pipeline_mode": pl.Buffered(1)} if single_buffer_invariants else {}
        return pl.pallas_call(
            _mlp_proj_kernel,
            out_shape=jax.ShapeDtypeStruct((B, HW, E), out_dtype),
            grid_spec=pltpu.PrefetchScalarGridSpec(
                num_scalar_prefetch=0,
                grid=(B, n_token_tiles),
                in_specs=[
                    pl.BlockSpec((1, C, tn), lambda b, t: (b, 0, t)),      # x slab
                    pl.BlockSpec((C, E), lambda b, t: (0, 0), **inv),      # weight (invariant)
                    pl.BlockSpec((1, E), lambda b, t: (0, 0), **inv),      # bias   (invariant)
                ],
                out_specs=pl.BlockSpec((1, tn, E), lambda b, t: (b, t, 0)),
            ),
            compiler_params=pltpu.CompilerParams(
                dimension_semantics=("parallel", "parallel"),
                vmem_limit_bytes=vmem_limit,
            ),
            cost_estimate=cost,
        )(x3d, w_t, b2d)

    try:
        return call(True)
    except Exception:
        # TODO(synk): drop this fallback once pl.Buffered(1) on grid-invariant
        # pallas_call operands is supported everywhere; it only costs one extra
        # resident weight buffer.
        return call(False)


if __name__ == "__main__":
    # Small shapes consistent with the module (SegFormer stage: C=64, embed=256).
    B, C, H, W = 2, 64, 16, 16
    E = 256

    key = jax.random.PRNGKey(0)
    kx, kw, kb = jax.random.split(key, 3)

    x = jax.random.normal(kx, (B, C, H, W), dtype=jnp.float32)
    weight = jax.random.normal(kw, (E, C), dtype=jnp.float32) * 0.02   # nn.Linear (E, C)
    bias = jax.random.normal(kb, (E,), dtype=jnp.float32) * 0.02

    # Reference: exact PyTorch semantics in plain JAX.
    x_tok = jnp.transpose(x.reshape(B, C, H * W), (0, 2, 1))
    ref = x_tok @ weight.T + bias

    # 1) f32 path -- matches the PyTorch module's numerics.
    out = jax.block_until_ready(mlp_forward(x, weight, bias))
    assert out.shape == (B, H * W, E)
    max_err = float(jnp.max(jnp.abs(out - ref)))
    assert jnp.allclose(out, ref, atol=2e-3, rtol=2e-3), max_err

    # 2) bf16 streaming + bf16 output path (producer hands x in bf16; the wrapper
    #    only casts the small weight).  Looser tolerance, per review.
    out_bf16 = jax.block_until_ready(
        mlp_forward(x.astype(jnp.bfloat16), weight, bias, out_dtype=jnp.bfloat16))
    assert out_bf16.shape == (B, H * W, E)
    assert out_bf16.dtype == jnp.bfloat16
    max_err_bf16 = float(jnp.max(jnp.abs(out_bf16.astype(jnp.float32) - ref)))
    assert max_err_bf16 < 3e-2, max_err_bf16

    print("KERNEL_OK")
</pallas_src>

<mosaic_0001>
module attributes {stable_mosaic.version = 11 : i64} {
  func.func @_mlp_proj_kernel(%arg0: i32, %arg1: i32, %arg2: memref<1x64x256xf32, #tpu.memory_space<vmem>>, %arg3: memref<64x256xf32, #tpu.memory_space<vmem>>, %arg4: memref<1x256xf32, #tpu.memory_space<vmem>>, %arg5: memref<1x256x256xf32, #tpu.memory_space<vmem>>) attributes {dimension_semantics = [#tpu.dimension_semantics<parallel>, #tpu.dimension_semantics<parallel>], iteration_bounds = array<i64: 2, 1>, scalar_prefetch = 0 : i64, scratch_operands = 0 : i64, tpu.core_type = #tpu.core_type<tc>, window_params = [{transform_indices = @transform_0, window_bounds = array<i64: 1, 64, 256>}, {pipeline_mode = #tpu.pipeline_mode<synchronous>, transform_indices = @transform_1, window_bounds = array<i64: 64, 256>}, {pipeline_mode = #tpu.pipeline_mode<synchronous>, transform_indices = @transform_2, window_bounds = array<i64: 1, 256>}, {transform_indices = @transform_3, window_bounds = array<i64: 1, 256, 256>}]} {
    %c0 = arith.constant 0 : index
    %c0_0 = arith.constant 0 : index
    %c0_1 = arith.constant 0 : index
    %0 = vector.load %arg2[%c0, %c0_0, %c0_1] : memref<1x64x256xf32, #tpu.memory_space<vmem>>, vector<1x64x256xf32>
    %1 = vector.shape_cast %0 : vector<1x64x256xf32> to vector<64x256xf32>
    %c0_2 = arith.constant 0 : index
    %c0_3 = arith.constant 0 : index
    %2 = vector.load %arg3[%c0_2, %c0_3] : memref<64x256xf32, #tpu.memory_space<vmem>>, vector<64x256xf32>
    %cst = arith.constant dense<0.000000e+00> : vector<256x256xf32>
    %3 = tpu.matmul %1, %2, %cst {dimension_numbers = #tpu.dot_dimension_numbers<[0], [0], [1], [1], [0, 1, 1, 1], [], []>} : vector<64x256xf32>, vector<64x256xf32>, vector<256x256xf32> -> vector<256x256xf32>
    %c0_4 = arith.constant 0 : index
    %c0_5 = arith.constant 0 : index
    %4 = vector.load %arg4[%c0_4, %c0_5] : memref<1x256xf32, #tpu.memory_space<vmem>>, vector<1x256xf32>
    %5 = vector.broadcast %4 : vector<1x256xf32> to vector<256x256xf32>
    %6 = arith.addf %3, %5 : vector<256x256xf32>
    %c0_6 = arith.constant 0 : index
    %c0_7 = arith.constant 0 : index
    %c0_8 = arith.constant 0 : index
    %7 = vector.load %arg5[%c0_6, %c0_7, %c0_8] : memref<1x256x256xf32, #tpu.memory_space<vmem>>, vector<1x256x256xf32>
    %8 = vector.shape_cast %7 : vector<1x256x256xf32> to vector<256x256xf32>
    %9 = vector.shape_cast %6 : vector<256x256xf32> to vector<1x256x256xf32>
    tpu.vector_store %arg5[%c0_6, %c0_7, %c0_8], %9 {strides = array<i32>} : memref<1x256x256xf32, #tpu.memory_space<vmem>>, vector<1x256x256xf32>,
    return
  }
  func.func @transform_0(%arg0: i32, %arg1: i32) -> (i32, i32, i32) {
    %c0_i32 = arith.constant 0 : i32
    %c0_i32_0 = arith.constant 0 : i32
    return %arg0, %c0_i32, %arg1 : i32, i32, i32
  }
  func.func @transform_1(%arg0: i32, %arg1: i32) -> (i32, i32) {
    %c0_i32 = arith.constant 0 : i32
    %c0_i32_0 = arith.constant 0 : i32
    %c0_i32_1 = arith.constant 0 : i32
    return %c0_i32, %c0_i32_0 : i32, i32
  }
  func.func @transform_2(%arg0: i32, %arg1: i32) -> (i32, i32) {
    %c0_i32 = arith.constant 0 : i32
    %c0_i32_0 = arith.constant 0 : i32
    %c0_i32_1 = arith.constant 0 : i32
    return %c0_i32, %c0_i32_0 : i32, i32
  }
  func.func @transform_3(%arg0: i32, %arg1: i32) -> (i32, i32, i32) {
    %c0_i32 = arith.constant 0 : i32
    %c0_i32_0 = arith.constant 0 : i32
    return %arg0, %arg1, %c0_i32 : i32, i32, i32
  }
}

module attributes {stable_mosaic.version = 11 : i64} {
  func.func @_mlp_proj_kernel(%arg0: i32, %arg1: i32, %arg2: memref<1x64x256xf32, #tpu.memory_space<vmem>>, %arg3: memref<64x256xf32, #tpu.memory_space<vmem>>, %arg4: memref<1x256xf32, #tpu.memory_space<vmem>>, %arg5: memref<1x256x256xf32, #tpu.memory_space<vmem>>) attributes {dimension_semantics = [#tpu.dimension_semantics<parallel>, #tpu.dimension_semantics<parallel>], iteration_bounds = array<i64: 2, 1>, scalar_prefetch = 0 : i64, scratch_operands = 0 : i64, tpu.core_type = #tpu.core_type<tc>, window_params = [{transform_indices = @transform_0, window_bounds = array<i64: 1, 64, 256>}, {pipeline_mode = #tpu.pipeline_mode<synchronous>, transform_indices = @transform_1, window_bounds = array<i64: 64, 256>}, {pipeline_mode = #tpu.pipeline_mode<synchronous>, transform_indices = @transform_2, window_bounds = array<i64: 1, 256>}, {transform_indices = @transform_3, window_bounds = array<i64: 1, 256, 256>}]} {
    %c0 = arith.constant 0 : index
    %c0_0 = arith.constant 0 : index
    %c0_1 = arith.constant 0 : index
    %0 = vector.load %arg2[%c0, %c0_0, %c0_1] : memref<1x64x256xf32, #tpu.memory_space<vmem>>, vector<1x64x256xf32>
    %1 = vector.shape_cast %0 : vector<1x64x256xf32> to vector<64x256xf32>
    %c0_2 = arith.constant 0 : index
    %c0_3 = arith.constant 0 : index
    %2 = vector.load %arg3[%c0_2, %c0_3] : memref<64x256xf32, #tpu.memory_space<vmem>>, vector<64x256xf32>
    %cst = arith.constant dense<0.000000e+00> : vector<256x256xf32>
    %3 = tpu.matmul %1, %2, %cst {dimension_numbers = #tpu.dot_dimension_numbers<[0], [0], [1], [1], [0, 1, 1, 1], [], []>} : vector<64x256xf32>, vector<64x256xf32>, vector<256x256xf32> -> vector<256x256xf32>
    %c0_4 = arith.constant 0 : index
    %c0_5 = arith.constant 0 : index
    %4 = vector.load %arg4[%c0_4, %c0_5] : memref<1x256xf32, #tpu.memory_space<vmem>>, vector<1x256xf32>
    %5 = vector.broadcast %4 : vector<1x256xf32> to vector<256x256xf32>
    %6 = arith.addf %3, %5 : vector<256x256xf32>
    %c0_6 = arith.constant 0 : index
    %c0_7 = arith.constant 0 : index
    %c0_8 = arith.constant 0 : index
    %7 = vector.load %arg5[%c0_6, %c0_7, %c0_8] : memref<1x256x256xf32, #tpu.memory_space<vmem>>, vector<1x256x256xf32>
    %8 = vector.shape_cast %7 : vector<1x256x256xf32> to vector<256x256xf32>
    %9 = vector.shape_cast %6 : vector<256x256xf32> to vector<1x256x256xf32>
    tpu.vector_store %arg5[%c0_6, %c0_7, %c0_8], %9 {strides = array<i32>} : memref<1x256x256xf32, #tpu.memory_space<vmem>>, vector<1x256x256xf32>,
    return
  }
  func.func @transform_0(%arg0: i32, %arg1: i32) -> (i32, i32, i32) {
    %c0_i32 = arith.constant 0 : i32
    %c0_i32_0 = arith.constant 0 : i32
    return %arg0, %c0_i32, %arg1 : i32, i32, i32
  }
  func.func @transform_1(%arg0: i32, %arg1: i32) -> (i32, i32) {
    %c0_i32 = arith.constant 0 : i32
    %c0_i32_0 = arith.constant 0 : i32
    %c0_i32_1 = arith.constant 0 : i32
    return %c0_i32, %c0_i32_0 : i32, i32
  }
  func.func @transform_2(%arg0: i32, %arg1: i32) -> (i32, i32) {
    %c0_i32 = arith.constant 0 : i32
    %c0_i32_0 = arith.constant 0 : i32
    %c0_i32_1 = arith.constant 0 : i32
    return %c0_i32, %c0_i32_0 : i32, i32
  }
  func.func @transform_3(%arg0: i32, %arg1: i32) -> (i32, i32, i32) {
    %c0_i32 = arith.constant 0 : i32
    %c0_i32_0 = arith.constant 0 : i32
    return %arg0, %arg1, %c0_i32 : i32, i32, i32
  }
}

</mosaic_0001>

<bundles_post_ra>
// kernel: tpu_custom_call.1
= control target key start
LH: loop header
LB: loop body
LE: loop exit
PB: predicated region body
PF: predicated region fallthrough
CT: control target
= control target key end

     0   :  { %8 = vsyncpa [#allocation3], 0  ;;  %s1637_s0 = inlined_call_operand.hbm [shape: f32[2,64,256], index: 0, kind: input, shape index: {}]   ;;  %s1638_s1 = inlined_call_operand.hbm [shape: f32[64,256], index: 1, kind: input, shape index: {}]   ;;  %s1639_s2 = inlined_call_operand.vmem [shape: f32[1,256], index: 2, kind: input, shape index: {}]   ;;  %s1640_s3 = inlined_call_operand.hbm [shape: f32[2,256,256], index: 3, kind: output, shape index: {}]  }
   0x1   :  { %10 = vsyncpa [#allocation3 + $0x1], 0 }
   0x2   :  { %11 = vsyncpa [#allocation6], 0 }
   0x3   :  { %12 = vsyncpa [#allocation4], 0 }
   0x4   :  { %14 = vsyncpa [#allocation4 + $0x1], 0  ;;  %s1191_s12 = smov 0   ;;  %s1193_s13 = smov 0  }
   0x5   :  { %s1195_s14 = smov 0   ;;  %s1197_s15 = smov 0  }
   0x6   :  { %s1199_s16 = smov 0   ;;  %s1201_s17 = smov 0  }
   0x7 LB: > { %s864_s18 = sadd.s32 4294967295, %s1161_s17   ;;  %s865_s19 = sadd.s32 4294967294, %s1161_s17   ;;  %s1161_s17 = sphi %s1201_s17, %s20_s17   ;;  %s1157_s16 = sphi %s1199_s16, %s1664_s16   ;;  %s1153_s15 = sphi %s1197_s15, %s1663_s15   ;;  %s1149_s14 = sphi %s1195_s14, %s1662_s14   ;;  %s1145_s13 = sphi %s1193_s13, %s1661_s13   ;;  %s1141_s12 = sphi %s1191_s12, %s1660_s12  }
   0x8   : > { %p54_p0 = scmp.ne.s32.totalorder %s1145_s13, %s1141_s12  ;;  %p1225_p1 = scmp.eq.s32.totalorder %s864_s18, 0 }
   0x9   : > { %p1229_p2 = scmp.eq.s32.totalorder %s864_s18, 1  ;;  %p128_p3 = scmp.eq.s32.totalorder %s865_s19, 1 }
   0xa   : > { %s1645_s20 = scalar_select %p1225_p1, 1, 0 }
   0xb   : > { %s1646_s21 = scalar_select %p1229_p2, 1, 0 }
   0xc   : > { %p1235_p4 = por %p1225_p1, %p54_p0  ;;  %p866_p5 = scmp.ge.s32.totalorder %s1161_s17, 1 }
   0xd   : > { %p1240_p6 = por %p128_p3, %p54_p0  ;;  %p135_p7 = scmp.lt.s32.totalorder %s1161_s17, 3 }
   0xe   : > { %s1647_s22 = scalar_select %p1235_p4, 1, 0 }
   0xf   : > { %s1648_s23 = scalar_select %p1240_p6, 1, 0 }
  0x10   : > { %p1245_p8 = pnand %p866_p5, %p135_p7  ;;  %s1163_s25 = smov [#allocation5]  }
  0x11   : > { %s147_s26 = sshll.u32 %s1163_s25, 4  ;;  %s32_s28 = sadd.s32 1, %s1157_s16  ;;  %s148_s26 = int_to_ptr.vmem [resolvable:$true] %s147_s26 }
  0x12   : > { %s1649_s24 = scalar_select %p1245_p8, 1, 0 }
  0x13   : > { %p947_p9 = pneg %p1245_p8  ;;  %s1017_s4 = scalar_lea.hbm %s1638_s1, 2048 }
  0x14   : > { %p1018_p12 = scmp.ne.s32.totalorder %s1638_s1, %s1017_s4  ;;  %p1024_p5 = scmp.lt.u32.totalorder %s1017_s4, %s1638_s1 }
  0x15   : > { %p1254_p11 = pnand %p947_p9, %p1225_p1 }
  0x17   : > { %p1019_p13 = pneg %p1254_p11 }
  0x19   : > { %p1020_p0 = pnand %p1019_p13, %p1018_p12 }
  0x1b   : > { %p1021_p3 = pneg %p1020_p0 }
  0x1d   : > { %p1026_p7 = pnand %p1024_p5, %p1021_p3 }
  0x1f   : > { %1029 = shalt.err (!%p1026_p7)
}
  0x20   : > { %s1030_s9 = scalar_lea.vmem %s148_s26, 2048  ;;  %p1038_p1 = scmp.lt.s32.totalorder %s148_s26, %s148_s26 }
  0x21   : > { %p1031_p9 = scmp.ne.s32.totalorder %s148_s26, %s1030_s9  ;;  %p1039_p4 = scmp.lt.s32.totalorder %s1030_s9, %s1030_s9 }
  0x23   : > { %p1033_p10 = pnand %p1031_p9, %p1019_p13  ;;  %p1040_p8 = por %p1039_p4, %p1038_p1 }
  0x25   : > { %p1034_p6 = pneg %p1033_p10 }
  0x27   : > { %p1041_p2 = pnand %p1040_p8, %p1034_p6 }
  0x29   : > { %1044 = shalt.err (!%p1041_p2)
}
  0x2a   : > { %s1164_s10 = smov 256   ;;  %s1165_s11 = smov 16  }
  0x2b   : > { %950 = dma.hbm_to_vmem [thread:$0]  (!%p1254_p11), %s1638_s1, 2048, %s148_s26, [#allocation6], %s1164_s10, %s1164_s10, %s1165_s11  }
  0x2c   : > { %p34_p1 = scmp.ge.s32.totalorder %s32_s28, 2  ;;  %s41_s25 = sadd.s32 1, %s1149_s14 }
  0x2d   : > { %p48_p2 = scmp.ne.s32.totalorder %s1149_s14, %s1145_s13  ;;  %p49_p4 = scmp.eq.s32.totalorder %s1161_s17, 0 }
  0x2e   : > { %s1666_s28 = smov (%p34_p1, %s32_s28), 0  ;;  %p1652_p8 = scmp.ne.s32.totalorder %s1646_s21, 0 }
  0x2f   : > { %p1284_p6 = por %p49_p4, %p48_p2  ;;  %s36_s30 = ssub.s32 %s1157_s16, %s1666_s28 }
  0x30   : > { %p1290_p10 = por %p1652_p8, %p48_p2  ;;  %p960_p12 = scmp.lt.s32.totalorder %s1161_s17, 2 }
  0x31   : > { %p39_p11 = scmp.eq.s32.totalorder %s36_s30, 0  ;;  %s164_s26 = sand.u32 1, %s1149_s14  }
  0x32   : > { %s869_s4 = sshll.u32 %s164_s26, 7  ;;  %s913_s6 = sshll.u32 %s1157_s16, 11 }
  0x33   : > { %s1299_s5 = scalar_select %p39_p11, %s1149_s14, %s41_s25  }
  0x34   : > { %s1305_s9 = scalar_lea.hbm %s1637_s0, %s913_s6  ;;  %s168_s21 = scalar_lea.vmem [#allocation2], %s869_s4 }
  0x35   : > { %s177_s18 = sshll.u32 %s168_s21, 4  ;;  %p1311_p13 = pnand %p960_p12, %p1284_p6  ;;  %s1307_s18 = int_to_ptr.vmem [resolvable:$true] %s177_s18 }
  0x36   : > { %s1315_s25 = scalar_lea.sflag [#allocation3], %s164_s26  ;;  %s1045_s30 = scalar_lea.hbm %s1305_s9, 2048 }
  0x37   : > { %p1046_p0 = scmp.ne.s32.totalorder %s1305_s9, %s1045_s30  ;;  %p1047_p3 = pneg %p1311_p13 }
  0x38   : > { %s1050_s29 = scalar_lea.hbm %s1637_s0, 4096  ;;  %p1051_p9 = scmp.lt.u32.totalorder %s1305_s9, %s1637_s0 }
  0x39   : > { %p1048_p5 = pnand %p1047_p3, %p1046_p0  ;;  %p1052_p1 = scmp.lt.u32.totalorder %s1050_s29, %s1045_s30 }
  0x3a   : > { %p1054_p4 = scmp.lt.u32.totalorder %s1045_s30, %s1305_s9 }
  0x3b   : > { %p1049_p7 = pneg %p1048_p5  ;;  %p1053_p2 = por %p1052_p1, %p1051_p9 }
  0x3d   : > { %p1055_p6 = por %p1054_p4, %p1053_p2 }
  0x3f   : > { %p1056_p8 = pnand %p1055_p6, %p1049_p7 }
  0x41   : > { %1059 = shalt.err (!%p1056_p8)
}
  0x42   : > { %s1060_s26 = scalar_lea.vmem %s1307_s18, 2048  ;;  %s1166_s21 = smov [#allocation2]  }
  0x43   : > { %p1061_p12 = scmp.ne.s32.totalorder %s1307_s18, %s1060_s26  ;;  %s1065_s4 = sshll.u32 %s1166_s21, 4  ;;  %s1066_s4 = int_to_ptr.vmem [resolvable:$false] %s1065_s4 }
  0x44   : > { %s1067_s6 = scalar_lea.vmem %s1066_s4, 4096  ;;  %p1068_p5 = scmp.lt.s32.totalorder %s1307_s18, %s1066_s4 }
  0x45   : > { %p1063_p11 = pnand %p1061_p12, %p1047_p3  ;;  %p1069_p9 = scmp.lt.s32.totalorder %s1067_s6, %s1060_s26 }
  0x47   : > { %p1064_p0 = pneg %p1063_p11  ;;  %p1070_p1 = por %p1069_p9, %p1068_p5 }
  0x49   : > { %p1071_p2 = pnand %p1070_p1, %p1064_p0 }
  0x4b   : > { %1074 = shalt.err (!%p1071_p2)
}
  0x4c   : > { %954 = dma.hbm_to_vmem [thread:$0]  (!%p1311_p13), %s1305_s9, 2048, %s1307_s18, %s1315_s25, %s1164_s10, %s1164_s10, %s1165_s11  }
  0x4d   : > { %p1655_p3 = scmp.ne.s32.totalorder %s1649_s24, 0 }
  0x4e   : > { %s1349_s30 = sand.u32 (!%p1655_p3), 1, %s1145_s13   ;;  %p1656_p7 = scmp.ne.s32.totalorder (!%p1655_p3), %s1647_s22, 0 }
  0x4f   : > { %189 = sbr.rel (%p1655_p3) target bundleno = 511 (0x1ff), region = 32  ;;  %s873_s29 = sshll.u32 (!%p1655_p3), %s1349_s30, 7 }
  0x50   : > { %s192_s7 = scalar_lea.sflag (!%p1655_p3), [#allocation3], %s1349_s30  ;;  %s1353_s8 = scalar_lea.vmem (!%p1655_p3), [#allocation2], %s873_s29 }
  0x56   : > { %1128 = dma.done.wait (%p1656_p7), %s192_s7, 2048  }
  0x57   : > { %1130 = vsyncadd (%p1656_p7), %s192_s7, 4294965248  ;;  %p1657_p13 = scmp.ne.s32.totalorder %s1645_s20, 0 }
  0x59   : > { %1132 = dma.done.wait (%p1657_p13), [#allocation6], 2048  }
  0x5a   : > { %1134 = vsyncadd (%p1657_p13), [#allocation6], 4294965248  ;;  %v1167_v0 = vmov 0.0   ;;  %v225_v1 = vld [vmem:[%s1353_s8 + $0x8] sm:$0xff]  ;;  %v224_v2 = vld [vmem:[%s1353_s8] sm:$0xff]  ;;  %vm332_vm0 = vcmask 523264  }
  0x5b   : > { %493 = vmatprep.mubr.f32.mxu0 %v1167_v0  ;;  %589 = vmatprep.mubr.f32.mxu1 %v1167_v0  ;;  %v227_v3 = vld [vmem:[%s1353_s8 + $0x18] sm:$0xff]  ;;  %v226_v4 = vld [vmem:[%s1353_s8 + $0x10] sm:$0xff]  ;;  %v229_v5 = vld [vmem:[%s1353_s8 + $0x28] sm:$0xff]  ;;  %s875_s24 = sshll.u32 %s1349_s30, 9  ;;  %s914_s11 = sshll.u32 %s1153_s15, 13 }
  0x5c   : > { %300 = vxpose.xlu1.b32.start [1/8] (short) %v225_v1, 128  ;;  %268 = vxpose.xlu0.b32.start [1/8] (short) %v224_v2, 128  ;;  %v228_v6 = vld [vmem:[%s1353_s8 + $0x20] sm:$0xff]  ;;  %v241_v7 = vld [vmem:[#allocation5 + $0x8] sm:$0xff]  ;;  %v243_v8 = vld [vmem:[#allocation5 + $0x18] sm:$0xff]  ;;  %s1455_s10 = scalar_lea.vmem [#allocation7], %s875_s24  ;;  %s1580_s19 = scalar_lea.hbm %s1640_s3, %s914_s11 }
  0x5d   : > { %v915_v9 = vpack.c.bf16 %v243_v8, %v241_v7  ;;  %v240_v10 = vld [vmem:[#allocation5] sm:$0xff]  ;;  %v242_v11 = vld [vmem:[#allocation5 + $0x10] sm:$0xff]  ;;  %v245_v12 = vld [vmem:[#allocation5 + $0x28] sm:$0xff]  ;;  %s767_s9 = sshll.u32 %s1455_s10, 4  ;;  %s751_s25 = scalar_lea.sflag [#allocation4], %s1349_s30  ;;  %s1582_s9 = int_to_ptr.vmem [resolvable:$true] %s767_s9 }
  0x5e   : > { %v917_v13 = vpack.c.bf16 %v242_v11, %v240_v10  ;;  %v247_v14 = vld [vmem:[#allocation5 + $0x38] sm:$0xff]  ;;  %v244_v15 = vld [vmem:[#allocation5 + $0x20] sm:$0xff]  ;;  %v246_v16 = vld [vmem:[#allocation5 + $0x30] sm:$0xff]  ;;  %v258_v10 = vlaneseq  ;;  %s1075_s26 = scalar_lea.vmem %s1582_s9, 8192  ;;  %s1168_s21 = smov [#allocation7]  }
  0x5f   : > { %916 = vmatprep.subr.bf16.mxu0 %v915_v9  ;;  %931 = vmatprep.subr.bf16.mxu1 %v915_v9  ;;  %v919_v17 = vpack.c.bf16 %v247_v14, %v245_v12  ;;  %v249_v18 = vld [vmem:[#allocation5 + $0x48] sm:$0xff]  ;;  %v251_v19 = vld [vmem:[#allocation5 + $0x58] sm:$0xff]  ;;  %v230_v21 = vld [vmem:[%s1353_s8 + $0x30] sm:$0xff]  ;;  %v921_v22 = vpack.c.bf16 %v246_v16, %v244_v15  ;;  %p1076_p4 = scmp.ne.s32.totalorder %s1582_s9, %s1075_s26  ;;  %s1079_s4 = sshll.u32 %s1168_s21, 4  ;;  %s1080_s4 = int_to_ptr.vmem [resolvable:$false] %s1079_s4 }
  0x60   : > { %301 = vxpose.xlu1.b32.cont [2/8] (short) %v227_v3, 128  ;;  %269 = vxpose.xlu0.b32.cont [2/8] (short) %v226_v4, 128  ;;  %v231_v20 = vld [vmem:[%s1353_s8 + $0x38] sm:$0xff]  ;;  %v923_v23 = vpack.c.bf16 %v251_v19, %v249_v18  ;;  %v248_v24 = vld [vmem:[#allocation5 + $0x40] sm:$0xff]  ;;  %v250_v25 = vld [vmem:[#allocation5 + $0x50] sm:$0xff]  ;;  %v259_v11 = vshrl.u32 %v258_v10, 7  ;;  %s1081_s6 = scalar_lea.vmem %s1080_s4, 16384  ;;  %p1082_p12 = scmp.lt.s32.totalorder %s1582_s9, %s1080_s4 }
  0x61   : > { %918 = vmatpush1.bf16.msra.mxu0 %v917_v13  ;;  %935 = vmatpush1.bf16.msra.mxu1 %v917_v13  ;;  %v253_v26 = vld [vmem:[#allocation5 + $0x68] sm:$0xff]  ;;  %v255_v27 = vld [vmem:[#allocation5 + $0x78] sm:$0xff]  ;;  %v232_v29 = vld [vmem:[%s1353_s8 + $0x40] sm:$0xff]  ;;  %v925_v30 = vpack.c.bf16 %v250_v25, %v248_v24  ;;  %p1077_p6 = pnand %p1076_p4, %p1290_p10  ;;  %p1083_p11 = scmp.lt.s32.totalorder %s1081_s6, %s1075_s26 }
  0x62   : > { %920 = vmatprep.subr.bf16.mxu0 %v919_v17  ;;  %932 = vmatprep.subr.bf16.mxu1 %v919_v17  ;;  %v233_v28 = vld [vmem:[%s1353_s8 + $0x48] sm:$0xff]  ;;  %v927_v31 = vpack.c.bf16 %v255_v27, %v253_v26  ;;  %v252_v32 = vld [vmem:[#allocation5 + $0x60] sm:$0xff]  ;;  %v254_v33 = vld [vmem:[#allocation5 + $0x70] sm:$0xff]  ;;  %v260_v12 = vsub.s32 0, %v259_v11  ;;  %v264_v14 = vsub.s32 1, %v259_v11 }
  0x63   : > { %v235_v34 = vld [vmem:[%s1353_s8 + $0x58] sm:$0xff]  ;;  %v234_v35 = vld [vmem:[%s1353_s8 + $0x50] sm:$0xff]  ;;  %v929_v36 = vpack.c.bf16 %v254_v33, %v252_v32  ;;  %v237_v37 = vld [vmem:[%s1353_s8 + $0x68] sm:$0xff]  ;;  %p1078_p8 = pneg %p1077_p6  ;;  %p1084_p0 = por %p1083_p11, %p1082_p12 }
  0x64   : > { %302 = vxpose.xlu1.b32.cont [3/8] (short) %v229_v5, 128  ;;  %270 = vxpose.xlu0.b32.cont [3/8] (short) %v228_v6, 128  ;;  %v236_v38 = vld [vmem:[%s1353_s8 + $0x60] sm:$0xff]  ;;  %v239_v39 = vld [vmem:[%s1353_s8 + $0x78] sm:$0xff]  ;;  %v238_v40 = vld [vmem:[%s1353_s8 + $0x70] sm:$0xff] }
  0x65   : > { %922 = vmatpush1.bf16.msra.mxu0 %v921_v22  ;;  %936 = vmatpush1.bf16.msra.mxu1 %v921_v22  ;;  %v256_v13 = vld [vmem:[%s1639_s2] sm:$0x3]  ;;  %p1085_p5 = pnand %p1084_p0, %p1078_p8 }
  0x66   : > { %924 = vmatprep.subr.bf16.mxu0 %v923_v23  ;;  %933 = vmatprep.subr.bf16.mxu1 %v923_v23  ;;  %v1447_v15 = vrot.slane %v256_v13, %v260_v12  ;;  %v1449_v16 = vrot.slane %v256_v13, %v264_v14 }
  0x68   : > { %303 = vxpose.xlu1.b32.cont [4/8] (short) %v231_v20, 128  ;;  %271 = vxpose.xlu0.b32.cont [4/8] (short) %v230_v21, 128 }
  0x69   : > { %926 = vmatpush1.bf16.msra.mxu0 %v925_v30  ;;  %937 = vmatpush1.bf16.msra.mxu1 %v925_v30 }
  0x6a   : > { %928 = vmatprep.subr.bf16.mxu0 %v927_v31  ;;  %934 = vmatprep.subr.bf16.mxu1 %v927_v31 }
  0x6c   : > { %304 = vxpose.xlu1.b32.cont [5/8] (short) %v233_v28, 128  ;;  %272 = vxpose.xlu0.b32.cont [5/8] (short) %v232_v29, 128 }
  0x6d   : > { %930 = vmatpush1.bf16.msra.mxu0 %v929_v36  ;;  %938 = vmatpush1.bf16.msra.mxu1 %v929_v36 }
  0x70   : > { %305 = vxpose.xlu1.b32.cont [6/8] (short) %v235_v34, 128  ;;  %273 = vxpose.xlu0.b32.cont [6/8] (short) %v234_v35, 128 }
  0x74   : > { %306 = vxpose.xlu1.b32.cont [7/8] (short) %v237_v37, 128  ;;  %274 = vxpose.xlu0.b32.cont [7/8] (short) %v236_v38, 128 }
  0x78   : > { %307 = vxpose.xlu1.b32.end [8/8] (short) %v239_v39, 128  ;;  %275 = vxpose.xlu0.b32.end [8/8] (short) %v238_v40, 128 }
  0xdc   : > { %v316_v41 = vpop.trf.xlu1  ;;  %v284_v42 = vpop.trf.xlu0 }
  0xdd   : > { %876 = vmatmul.mubr.msk.f32.vlgmr.msra.gmra.mrb[0].mxu0 %vm332_vm0, %v284_v42  ;;  %892 = vmatmul.mubr.msk.f32.vlgmr.msra.gmra.mrb[0].mxu1 %vm332_vm0, %v316_v41 }
  0xde   : > { %595 = vmatprep.mubr.f32.mxu1 %v1167_v0  ;;  %499 = vmatprep.mubr.f32.mxu0 %v1167_v0 }
  0xe0   : > { %v317_v43 = vpop.trf.xlu1  ;;  %v285_v44 = vpop.trf.xlu0 }
  0xe1   : > { %877 = vmatmul.mubr.msk.f32.gmra.mrb[2].mxu0 %vm332_vm0, %v285_v44  ;;  %893 = vmatmul.mubr.msk.f32.gmra.mrb[2].mxu1 %vm332_vm0, %v317_v43 }
  0xe2   : > { %601 = vmatprep.mubr.f32.mxu1 %v1167_v0  ;;  %505 = vmatprep.mubr.f32.mxu0 %v1167_v0 }
  0xe4   : > { %v318_v45 = vpop.trf.xlu1  ;;  %v286_v46 = vpop.trf.xlu0 }
  0xe5   : > { %878 = vmatmul.mubr.msk.f32.gmra.mrb[4].mxu0 %vm332_vm0, %v286_v46  ;;  %894 = vmatmul.mubr.msk.f32.gmra.mrb[4].mxu1 %vm332_vm0, %v318_v45 }
  0xe6   : > { %607 = vmatprep.mubr.f32.mxu1 %v1167_v0  ;;  %511 = vmatprep.mubr.f32.mxu0 %v1167_v0 }
  0xe8   : > { %v319_v47 = vpop.trf.xlu1  ;;  %v287_v48 = vpop.trf.xlu0 }
  0xe9   : > { %879 = vmatmul.mubr.msk.f32.gmra.mrb[6].mxu0 %vm332_vm0, %v287_v48  ;;  %895 = vmatmul.mubr.msk.f32.gmra.mrb[6].mxu1 %vm332_vm0, %v319_v47 }
  0xea   : > { %613 = vmatprep.mubr.f32.mxu1 %v1167_v0  ;;  %517 = vmatprep.mubr.f32.mxu0 %v1167_v0 }
  0xec   : > { %v320_v49 = vpop.trf.xlu1  ;;  %v288_v50 = vpop.trf.xlu0 }
  0xed   : > { %880 = vmatmul.mubr.msk.f32.gmra.mrb[8].mxu0 %vm332_vm0, %v288_v50  ;;  %896 = vmatmul.mubr.msk.f32.gmra.mrb[8].mxu1 %vm332_vm0, %v320_v49 }
  0xee   : > { %619 = vmatprep.mubr.f32.mxu1 %v1167_v0  ;;  %523 = vmatprep.mubr.f32.mxu0 %v1167_v0 }
  0xf0   : > { %v321_v51 = vpop.trf.xlu1  ;;  %v289_v52 = vpop.trf.xlu0 }
  0xf1   : > { %881 = vmatmul.mubr.msk.f32.gmra.mrb[10].mxu0 %vm332_vm0, %v289_v52  ;;  %897 = vmatmul.mubr.msk.f32.gmra.mrb[10].mxu1 %vm332_vm0, %v321_v51 }
  0xf2   : > { %625 = vmatprep.mubr.f32.mxu1 %v1167_v0  ;;  %529 = vmatprep.mubr.f32.mxu0 %v1167_v0 }
  0xf4   : > { %v322_v53 = vpop.trf.xlu1  ;;  %v290_v54 = vpop.trf.xlu0 }
  0xf5   : > { %882 = vmatmul.mubr.msk.f32.gmra.mrb[12].mxu0 %vm332_vm0, %v290_v54  ;;  %898 = vmatmul.mubr.msk.f32.gmra.mrb[12].mxu1 %vm332_vm0, %v322_v53 }
  0xf6   : > { %631 = vmatprep.mubr.f32.mxu1 %v1167_v0  ;;  %535 = vmatprep.mubr.f32.mxu0 %v1167_v0 }
  0xf8   : > { %v323_v55 = vpop.trf.xlu1  ;;  %v291_v56 = vpop.trf.xlu0 }
  0xf9   : > { %883 = vmatmul.mubr.msk.f32.gmra.mrb[14].mxu0 %vm332_vm0, %v291_v56  ;;  %899 = vmatmul.mubr.msk.f32.gmra.mrb[14].mxu1 %vm332_vm0, %v323_v55 }
  0xfa   : > { %637 = vmatprep.mubr.f32.mxu1 %v1167_v0  ;;  %541 = vmatprep.mubr.f32.mxu0 %v1167_v0 }
  0xfc   : > { %v324_v57 = vpop.trf.xlu1  ;;  %v292_v58 = vpop.trf.xlu0 }
  0xfd   : > { %884 = vmatmul.mubr.msk.f32.gmra.mrb[16].mxu0 %vm332_vm0, %v292_v58  ;;  %900 = vmatmul.mubr.msk.f32.gmra.mrb[16].mxu1 %vm332_vm0, %v324_v57 }
  0xfe   : > { %643 = vmatprep.mubr.f32.mxu1 %v1167_v0  ;;  %547 = vmatprep.mubr.f32.mxu0 %v1167_v0 }
 0x100   : > { %v325_v59 = vpop.trf.xlu1  ;;  %v293_v60 = vpop.trf.xlu0 }
 0x101   : > { %885 = vmatmul.mubr.msk.f32.gmra.mrb[18].mxu0 %vm332_vm0, %v293_v60  ;;  %901 = vmatmul.mubr.msk.f32.gmra.mrb[18].mxu1 %vm332_vm0, %v325_v59 }
 0x102   : > { %649 = vmatprep.mubr.f32.mxu1 %v1167_v0  ;;  %553 = vmatprep.mubr.f32.mxu0 %v1167_v0 }
 0x104   : > { %v326_v61 = vpop.trf.xlu1  ;;  %v294_v62 = vpop.trf.xlu0 }
 0x105   : > { %886 = vmatmul.mubr.msk.f32.gmra.mrb[20].mxu0 %vm332_vm0, %v294_v62  ;;  %902 = vmatmul.mubr.msk.f32.gmra.mrb[20].mxu1 %vm332_vm0, %v326_v61 }
 0x106   : > { %655 = vmatprep.mubr.f32.mxu1 %v1167_v0  ;;  %559 = vmatprep.mubr.f32.mxu0 %v1167_v0 }
 0x108   : > { %v327_v63 = vpop.trf.xlu1  ;;  %v295_v1 = vpop.trf.xlu0 }
 0x109   : > { %887 = vmatmul.mubr.msk.f32.gmra.mrb[22].mxu0 %vm332_vm0, %v295_v1  ;;  %903 = vmatmul.mubr.msk.f32.gmra.mrb[22].mxu1 %vm332_vm0, %v327_v63 }
 0x10a   : > { %661 = vmatprep.mubr.f32.mxu1 %v1167_v0  ;;  %565 = vmatprep.mubr.f32.mxu0 %v1167_v0 }
 0x10c   : > { %v328_v2 = vpop.trf.xlu1  ;;  %v296_v3 = vpop.trf.xlu0 }
 0x10d   : > { %888 = vmatmul.mubr.msk.f32.gmra.mrb[24].mxu0 %vm332_vm0, %v296_v3  ;;  %904 = vmatmul.mubr.msk.f32.gmra.mrb[24].mxu1 %vm332_vm0, %v328_v2 }
 0x10e   : > { %667 = vmatprep.mubr.f32.mxu1 %v1167_v0  ;;  %571 = vmatprep.mubr.f32.mxu0 %v1167_v0 }
 0x110   : > { %v329_v4 = vpop.trf.xlu1  ;;  %v297_v5 = vpop.trf.xlu0 }
 0x111   : > { %889 = vmatmul.mubr.msk.f32.gmra.mrb[26].mxu0 %vm332_vm0, %v297_v5  ;;  %905 = vmatmul.mubr.msk.f32.gmra.mrb[26].mxu1 %vm332_vm0, %v329_v4 }
 0x112   : > { %673 = vmatprep.mubr.f32.mxu1 %v1167_v0  ;;  %577 = vmatprep.mubr.f32.mxu0 %v1167_v0 }
 0x114   : > { %v330_v6 = vpop.trf.xlu1  ;;  %v298_v7 = vpop.trf.xlu0 }
 0x115   : > { %890 = vmatmul.mubr.msk.f32.gmra.mrb[28].mxu0 %vm332_vm0, %v298_v7  ;;  %906 = vmatmul.mubr.msk.f32.gmra.mrb[28].mxu1 %vm332_vm0, %v330_v6 }
 0x116   : > { %679 = vmatprep.mubr.f32.mxu1 %v1167_v0  ;;  %583 = vmatprep.mubr.f32.mxu0 %v1167_v0 }
 0x118   : > { %v331_v8 = vpop.trf.xlu1  ;;  %v299_v9 = vpop.trf.xlu0 }
 0x119   : > { %891 = vmatmul.mubr.msk.f32.gmra.mrb[30].mxu0 %vm332_vm0, %v299_v9  ;;  %907 = vmatmul.mubr.msk.f32.gmra.mrb[30].mxu1 %vm332_vm0, %v331_v8 }
 0x1b0   : > { %v495_v0 = vpop.f32.mrb[0].mxu0  ;;  %v591_v17 = vpop.f32.mrb[0].mxu1 }
 0x1b1   : > { %v496_v18 = vadd.f32 %v495_v0, %v1447_v15  ;;  %v592_v19 = vadd.f32 %v591_v17, %v1447_v15  ;;  %v497_v20 = vpop.f32.mrb[1].mxu0  ;;  %v593_v21 = vpop.f32.mrb[1].mxu1 }
 0x1b2   : > { %v498_v22 = vadd.f32 %v497_v20, %v1449_v16  ;;  %v594_v23 = vadd.f32 %v593_v21, %v1449_v16 }
 0x1b3   : > { %686 = vst [vmem:[%s1455_s10] sm:$0xff] %v496_v18  ;;  %718 = vst [vmem:[%s1455_s10 + $0x100] sm:$0xff] %v592_v19 }
 0x1b4   : > { %687 = vst [vmem:[%s1455_s10 + $0x8] sm:$0xff] %v498_v22  ;;  %719 = vst [vmem:[%s1455_s10 + $0x108] sm:$0xff] %v594_v23  ;;  %v501_v24 = vpop.f32.mrb[2].mxu0  ;;  %v597_v25 = vpop.f32.mrb[2].mxu1 }
 0x1b5   : > { %v502_v26 = vadd.f32 %v501_v24, %v1447_v15  ;;  %v598_v27 = vadd.f32 %v597_v25, %v1447_v15  ;;  %v503_v28 = vpop.f32.mrb[3].mxu0  ;;  %v599_v29 = vpop.f32.mrb[3].mxu1 }
 0x1b6   : > { %v504_v30 = vadd.f32 %v503_v28, %v1449_v16  ;;  %v600_v31 = vadd.f32 %v599_v29, %v1449_v16 }
 0x1b7   : > { %688 = vst [vmem:[%s1455_s10 + $0x10] sm:$0xff] %v502_v26  ;;  %720 = vst [vmem:[%s1455_s10 + $0x110] sm:$0xff] %v598_v27 }
 0x1b8   : > { %689 = vst [vmem:[%s1455_s10 + $0x18] sm:$0xff] %v504_v30  ;;  %721 = vst [vmem:[%s1455_s10 + $0x118] sm:$0xff] %v600_v31  ;;  %v507_v32 = vpop.f32.mrb[4].mxu0  ;;  %v603_v33 = vpop.f32.mrb[4].mxu1 }
 0x1b9   : > { %v508_v34 = vadd.f32 %v507_v32, %v1447_v15  ;;  %v604_v35 = vadd.f32 %v603_v33, %v1447_v15  ;;  %v509_v36 = vpop.f32.mrb[5].mxu0  ;;  %v605_v37 = vpop.f32.mrb[5].mxu1 }
 0x1ba   : > { %v510_v38 = vadd.f32 %v509_v36, %v1449_v16  ;;  %v606_v39 = vadd.f32 %v605_v37, %v1449_v16 }
 0x1bb   : > { %690 = vst [vmem:[%s1455_s10 + $0x20] sm:$0xff] %v508_v34  ;;  %722 = vst [vmem:[%s1455_s10 + $0x120] sm:$0xff] %v604_v35 }
 0x1bc   : > { %691 = vst [vmem:[%s1455_s10 + $0x28] sm:$0xff] %v510_v38  ;;  %723 = vst [vmem:[%s1455_s10 + $0x128] sm:$0xff] %v606_v39  ;;  %v513_v40 = vpop.f32.mrb[6].mxu0  ;;  %v609_v41 = vpop.f32.mrb[6].mxu1 }
 0x1bd   : > { %v514_v42 = vadd.f32 %v513_v40, %v1447_v15  ;;  %v610_v43 = vadd.f32 %v609_v41, %v1447_v15  ;;  %v515_v44 = vpop.f32.mrb[7].mxu0  ;;  %v611_v45 = vpop.f32.mrb[7].mxu1 }
 0x1be   : > { %v516_v46 = vadd.f32 %v515_v44, %v1449_v16  ;;  %v612_v47 = vadd.f32 %v611_v45, %v1449_v16 }
 0x1bf   : > { %692 = vst [vmem:[%s1455_s10 + $0x30] sm:$0xff] %v514_v42  ;;  %724 = vst [vmem:[%s1455_s10 + $0x130] sm:$0xff] %v610_v43 }
 0x1c0   : > { %693 = vst [vmem:[%s1455_s10 + $0x38] sm:$0xff] %v516_v46  ;;  %725 = vst [vmem:[%s1455_s10 + $0x138] sm:$0xff] %v612_v47  ;;  %v519_v48 = vpop.f32.mrb[8].mxu0  ;;  %v615_v49 = vpop.f32.mrb[8].mxu1 }
 0x1c1   : > { %v520_v50 = vadd.f32 %v519_v48, %v1447_v15  ;;  %v616_v51 = vadd.f32 %v615_v49, %v1447_v15  ;;  %v521_v52 = vpop.f32.mrb[9].mxu0  ;;  %v617_v53 = vpop.f32.mrb[9].mxu1 }
 0x1c2   : > { %v522_v54 = vadd.f32 %v521_v52, %v1449_v16  ;;  %v618_v55 = vadd.f32 %v617_v53, %v1449_v16 }
 0x1c3   : > { %694 = vst [vmem:[%s1455_s10 + $0x40] sm:$0xff] %v520_v50  ;;  %726 = vst [vmem:[%s1455_s10 + $0x140] sm:$0xff] %v616_v51 }
 0x1c4   : > { %695 = vst [vmem:[%s1455_s10 + $0x48] sm:$0xff] %v522_v54  ;;  %727 = vst [vmem:[%s1455_s10 + $0x148] sm:$0xff] %v618_v55  ;;  %v525_v56 = vpop.f32.mrb[10].mxu0  ;;  %v621_v57 = vpop.f32.mrb[10].mxu1 }
 0x1c5   : > { %v526_v58 = vadd.f32 %v525_v56, %v1447_v15  ;;  %v622_v59 = vadd.f32 %v621_v57, %v1447_v15  ;;  %v527_v60 = vpop.f32.mrb[11].mxu0  ;;  %v623_v61 = vpop.f32.mrb[11].mxu1 }
 0x1c6   : > { %v528_v62 = vadd.f32 %v527_v60, %v1449_v16  ;;  %v624_v63 = vadd.f32 %v623_v61, %v1449_v16 }
 0x1c7   : > { %696 = vst [vmem:[%s1455_s10 + $0x50] sm:$0xff] %v526_v58  ;;  %728 = vst [vmem:[%s1455_s10 + $0x150] sm:$0xff] %v622_v59 }
 0x1c8   : > { %697 = vst [vmem:[%s1455_s10 + $0x58] sm:$0xff] %v528_v62  ;;  %729 = vst [vmem:[%s1455_s10 + $0x158] sm:$0xff] %v624_v63  ;;  %v531_v1 = vpop.f32.mrb[12].mxu0  ;;  %v627_v2 = vpop.f32.mrb[12].mxu1 }
 0x1c9   : > { %v532_v3 = vadd.f32 %v531_v1, %v1447_v15  ;;  %v628_v4 = vadd.f32 %v627_v2, %v1447_v15  ;;  %v533_v5 = vpop.f32.mrb[13].mxu0  ;;  %v629_v6 = vpop.f32.mrb[13].mxu1 }
 0x1ca   : > { %v534_v7 = vadd.f32 %v533_v5, %v1449_v16  ;;  %v630_v8 = vadd.f32 %v629_v6, %v1449_v16 }
 0x1cb   : > { %698 = vst [vmem:[%s1455_s10 + $0x60] sm:$0xff] %v532_v3  ;;  %730 = vst [vmem:[%s1455_s10 + $0x160] sm:$0xff] %v628_v4 }
 0x1cc   : > { %699 = vst [vmem:[%s1455_s10 + $0x68] sm:$0xff] %v534_v7  ;;  %731 = vst [vmem:[%s1455_s10 + $0x168] sm:$0xff] %v630_v8  ;;  %v537_v9 = vpop.f32.mrb[14].mxu0  ;;  %v633_v10 = vpop.f32.mrb[14].mxu1 }
 0x1cd   : > { %v538_v11 = vadd.f32 %v537_v9, %v1447_v15  ;;  %v634_v12 = vadd.f32 %v633_v10, %v1447_v15  ;;  %v539_v13 = vpop.f32.mrb[15].mxu0  ;;  %v635_v14 = vpop.f32.mrb[15].mxu1 }
 0x1ce   : > { %v540_v0 = vadd.f32 %v539_v13, %v1449_v16  ;;  %v636_v17 = vadd.f32 %v635_v14, %v1449_v16 }
 0x1cf   : > { %700 = vst [vmem:[%s1455_s10 + $0x70] sm:$0xff] %v538_v11  ;;  %732 = vst [vmem:[%s1455_s10 + $0x170] sm:$0xff] %v634_v12 }
 0x1d0   : > { %701 = vst [vmem:[%s1455_s10 + $0x78] sm:$0xff] %v540_v0  ;;  %733 = vst [vmem:[%s1455_s10 + $0x178] sm:$0xff] %v636_v17  ;;  %v543_v18 = vpop.f32.mrb[16].mxu0  ;;  %v639_v19 = vpop.f32.mrb[16].mxu1 }
 0x1d1   : > { %v544_v20 = vadd.f32 %v543_v18, %v1447_v15  ;;  %v640_v21 = vadd.f32 %v639_v19, %v1447_v15  ;;  %v545_v22 = vpop.f32.mrb[17].mxu0  ;;  %v641_v23 = vpop.f32.mrb[17].mxu1 }
 0x1d2   : > { %v546_v24 = vadd.f32 %v545_v22, %v1449_v16  ;;  %v642_v25 = vadd.f32 %v641_v23, %v1449_v16 }
 0x1d3   : > { %702 = vst [vmem:[%s1455_s10 + $0x80] sm:$0xff] %v544_v20  ;;  %734 = vst [vmem:[%s1455_s10 + $0x180] sm:$0xff] %v640_v21 }
 0x1d4   : > { %703 = vst [vmem:[%s1455_s10 + $0x88] sm:$0xff] %v546_v24  ;;  %735 = vst [vmem:[%s1455_s10 + $0x188] sm:$0xff] %v642_v25  ;;  %v549_v26 = vpop.f32.mrb[18].mxu0  ;;  %v645_v27 = vpop.f32.mrb[18].mxu1 }
 0x1d5   : > { %v550_v28 = vadd.f32 %v549_v26, %v1447_v15  ;;  %v646_v29 = vadd.f32 %v645_v27, %v1447_v15  ;;  %v551_v30 = vpop.f32.mrb[19].mxu0  ;;  %v647_v31 = vpop.f32.mrb[19].mxu1 }
 0x1d6   : > { %v552_v32 = vadd.f32 %v551_v30, %v1449_v16  ;;  %v648_v33 = vadd.f32 %v647_v31, %v1449_v16 }
 0x1d7   : > { %704 = vst [vmem:[%s1455_s10 + $0x90] sm:$0xff] %v550_v28  ;;  %736 = vst [vmem:[%s1455_s10 + $0x190] sm:$0xff] %v646_v29 }
 0x1d8   : > { %705 = vst [vmem:[%s1455_s10 + $0x98] sm:$0xff] %v552_v32  ;;  %737 = vst [vmem:[%s1455_s10 + $0x198] sm:$0xff] %v648_v33  ;;  %v555_v34 = vpop.f32.mrb[20].mxu0  ;;  %v651_v35 = vpop.f32.mrb[20].mxu1 }
 0x1d9   : > { %v556_v36 = vadd.f32 %v555_v34, %v1447_v15  ;;  %v652_v37 = vadd.f32 %v651_v35, %v1447_v15  ;;  %v557_v38 = vpop.f32.mrb[21].mxu0  ;;  %v653_v39 = vpop.f32.mrb[21].mxu1 }
 0x1da   : > { %v558_v40 = vadd.f32 %v557_v38, %v1449_v16  ;;  %v654_v41 = vadd.f32 %v653_v39, %v1449_v16 }
 0x1db   : > { %706 = vst [vmem:[%s1455_s10 + $0xa0] sm:$0xff] %v556_v36  ;;  %738 = vst [vmem:[%s1455_s10 + $0x1a0] sm:$0xff] %v652_v37 }
 0x1dc   : > { %707 = vst [vmem:[%s1455_s10 + $0xa8] sm:$0xff] %v558_v40  ;;  %739 = vst [vmem:[%s1455_s10 + $0x1a8] sm:$0xff] %v654_v41  ;;  %v561_v42 = vpop.f32.mrb[22].mxu0  ;;  %v657_v43 = vpop.f32.mrb[22].mxu1 }
 0x1dd   : > { %v562_v44 = vadd.f32 %v561_v42, %v1447_v15  ;;  %v658_v45 = vadd.f32 %v657_v43, %v1447_v15  ;;  %v563_v46 = vpop.f32.mrb[23].mxu0  ;;  %v659_v47 = vpop.f32.mrb[23].mxu1 }
 0x1de   : > { %v564_v48 = vadd.f32 %v563_v46, %v1449_v16  ;;  %v660_v49 = vadd.f32 %v659_v47, %v1449_v16 }
 0x1df   : > { %708 = vst [vmem:[%s1455_s10 + $0xb0] sm:$0xff] %v562_v44  ;;  %740 = vst [vmem:[%s1455_s10 + $0x1b0] sm:$0xff] %v658_v45 }
 0x1e0   : > { %709 = vst [vmem:[%s1455_s10 + $0xb8] sm:$0xff] %v564_v48  ;;  %741 = vst [vmem:[%s1455_s10 + $0x1b8] sm:$0xff] %v660_v49  ;;  %v567_v50 = vpop.f32.mrb[24].mxu0  ;;  %v663_v51 = vpop.f32.mrb[24].mxu1 }
 0x1e1   : > { %v568_v52 = vadd.f32 %v567_v50, %v1447_v15  ;;  %v664_v53 = vadd.f32 %v663_v51, %v1447_v15  ;;  %v569_v54 = vpop.f32.mrb[25].mxu0  ;;  %v665_v55 = vpop.f32.mrb[25].mxu1 }
 0x1e2   : > { %v570_v56 = vadd.f32 %v569_v54, %v1449_v16  ;;  %v666_v57 = vadd.f32 %v665_v55, %v1449_v16 }
 0x1e3   : > { %710 = vst [vmem:[%s1455_s10 + $0xc0] sm:$0xff] %v568_v52  ;;  %742 = vst [vmem:[%s1455_s10 + $0x1c0] sm:$0xff] %v664_v53 }
 0x1e4   : > { %711 = vst [vmem:[%s1455_s10 + $0xc8] sm:$0xff] %v570_v56  ;;  %743 = vst [vmem:[%s1455_s10 + $0x1c8] sm:$0xff] %v666_v57  ;;  %v573_v58 = vpop.f32.mrb[26].mxu0  ;;  %v669_v59 = vpop.f32.mrb[26].mxu1 }
 0x1e5   : > { %v574_v60 = vadd.f32 %v573_v58, %v1447_v15  ;;  %v670_v61 = vadd.f32 %v669_v59, %v1447_v15  ;;  %v575_v62 = vpop.f32.mrb[27].mxu0  ;;  %v671_v63 = vpop.f32.mrb[27].mxu1 }
 0x1e6   : > { %v576_v1 = vadd.f32 %v575_v62, %v1449_v16  ;;  %v672_v2 = vadd.f32 %v671_v63, %v1449_v16 }
 0x1e7   : > { %712 = vst [vmem:[%s1455_s10 + $0xd0] sm:$0xff] %v574_v60  ;;  %744 = vst [vmem:[%s1455_s10 + $0x1d0] sm:$0xff] %v670_v61 }
 0x1e8   : > { %713 = vst [vmem:[%s1455_s10 + $0xd8] sm:$0xff] %v576_v1  ;;  %745 = vst [vmem:[%s1455_s10 + $0x1d8] sm:$0xff] %v672_v2  ;;  %v579_v3 = vpop.f32.mrb[28].mxu0  ;;  %v675_v4 = vpop.f32.mrb[28].mxu1 }
 0x1e9   : > { %v580_v5 = vadd.f32 %v579_v3, %v1447_v15  ;;  %v676_v6 = vadd.f32 %v675_v4, %v1447_v15  ;;  %v581_v7 = vpop.f32.mrb[29].mxu0  ;;  %v677_v8 = vpop.f32.mrb[29].mxu1 }
 0x1ea   : > { %v582_v9 = vadd.f32 %v581_v7, %v1449_v16  ;;  %v678_v10 = vadd.f32 %v677_v8, %v1449_v16 }
 0x1eb   : > { %714 = vst [vmem:[%s1455_s10 + $0xe0] sm:$0xff] %v580_v5  ;;  %746 = vst [vmem:[%s1455_s10 + $0x1e0] sm:$0xff] %v676_v6 }
 0x1ec   : > { %715 = vst [vmem:[%s1455_s10 + $0xe8] sm:$0xff] %v582_v9  ;;  %747 = vst [vmem:[%s1455_s10 + $0x1e8] sm:$0xff] %v678_v10  ;;  %v585_v11 = vpop.f32.mrb[30].mxu0  ;;  %v681_v12 = vpop.f32.mrb[30].mxu1 }
 0x1ed   : > { %v586_v13 = vadd.f32 %v585_v11, %v1447_v15  ;;  %v682_v14 = vadd.f32 %v681_v12, %v1447_v15  ;;  %v587_v0 = vpop.f32.mrb[31].mxu0  ;;  %v683_v17 = vpop.f32.mrb[31].mxu1 }
 0x1ee   : > { %v588_v18 = vadd.f32 %v587_v0, %v1449_v16  ;;  %v684_v19 = vadd.f32 %v683_v17, %v1449_v16 }
 0x1ef   : > { %716 = vst [vmem:[%s1455_s10 + $0xf0] sm:$0xff] %v586_v13  ;;  %748 = vst [vmem:[%s1455_s10 + $0x1f0] sm:$0xff] %v682_v14 }
 0x1f0   : > { %717 = vst [vmem:[%s1455_s10 + $0xf8] sm:$0xff] %v588_v18  ;;  %749 = vst [vmem:[%s1455_s10 + $0x1f8] sm:$0xff] %v684_v19 }
 0x1f1   : > { %1088 = shalt.err (!%p1085_p5)
}
 0x1f2   : > { %s1089_s29 = scalar_lea.hbm %s1580_s19, 8192  ;;  %s1093_s20 = scalar_lea.hbm %s1640_s3, 16384 }
 0x1f3   : > { %p1090_p9 = scmp.ne.s32.totalorder %s1580_s19, %s1089_s29  ;;  %p1094_p3 = scmp.lt.u32.totalorder %s1580_s19, %s1640_s3 }
 0x1f4   : > { %p1095_p7 = scmp.lt.u32.totalorder %s1093_s20, %s1089_s29  ;;  %p1097_p4 = scmp.lt.u32.totalorder %s1089_s29, %s1580_s19 }
 0x1f5   : > { %p1091_p1 = pnand %p1090_p9, %p1290_p10 }
 0x1f6   : > { %p1096_p13 = por %p1095_p7, %p1094_p3 }
 0x1f7   : > { %p1092_p2 = pneg %p1091_p1 }
 0x1f8   : > { %p1098_p6 = por %p1097_p4, %p1096_p13 }
 0x1fa   : > { %p1099_p8 = pnand %p1098_p6, %p1092_p2 }
 0x1fc   : > { %1102 = shalt.err (!%p1099_p8)
}
 0x1fd   : > { %s1169_s10 = smov 256   ;;  %s1170_s11 = smov 16  }
 0x1fe   : > { %945 = dma.vmem_to_hbm [thread:$0]  (%p1290_p10), %s1582_s9, 8192, %s1580_s19, %s751_s25, %s1169_s10, %s1169_s10, %s1170_s11  }
 0x1ff PF: > { %s782_s15 = sand.u32 1, %s1141_s12   ;;  %p1658_p12 = scmp.ne.s32.totalorder %s1648_s23, 0 }
 0x200   : > { %p1659_p11 = scmp.ge.s32.totalorder %s1161_s17, 2  ;;  %s783_s18 = scalar_lea.sflag [#allocation4], %s782_s15 }
 0x202   : > { %p956_p0 = pnand %p1659_p11, %p1658_p12 }
 0x204   : > { %1136 = dma.done.wait (!%p956_p0), %s783_s18, 8192  }
 0x205   : > { %1138 = vsyncadd (!%p956_p0), %s783_s18, 4294959104  ;;  %s20_s17 = sadd.s32 1, %s1161_s17   ;;  %s1660_s12 = smov %s1145_s13 }
 0x206   : > { %p17_p5 = scmp.ge.s32.totalorder %s20_s17, 4   ;;  %s1661_s13 = smov %s1149_s14 }
 0x207   : > { %s1662_s14 = smov %s1299_s5  ;;  %s1663_s15 = smov %s1157_s16 }
 0x208   : > { %s1664_s16 = smov %s1666_s28  ;;  %19 = sbr.rel (!%p17_p5) target bundleno = 7 (0x7), region = 81 }
 0x20f   :  { %788 = vsyncpa [#allocation3], 1 }
 0x210   :  { %790 = vsyncpa [#allocation3 + $0x1], 1 }
 0x211   :  { %791 = vsyncpa [#allocation6], 1 }
 0x212   :  { %792 = vsyncpa [#allocation4], 1 }
 0x213   :  { %794 = vsyncpa [#allocation4 + $0x1], 1 }

// kernel: tpu_custom_call.1
= control target key start
LH: loop header
LB: loop body
LE: loop exit
PB: predicated region body
PF: predicated region fallthrough
CT: control target
= control target key end

     0   :  { %8 = vsyncpa [#allocation3], 0  ;;  %s1637_s0 = inlined_call_operand.hbm [shape: f32[2,64,256], index: 0, kind: input, shape index: {}]   ;;  %s1638_s1 = inlined_call_operand.hbm [shape: f32[64,256], index: 1, kind: input, shape index: {}]   ;;  %s1639_s2 = inlined_call_operand.vmem [shape: f32[1,256], index: 2, kind: input, shape index: {}]   ;;  %s1640_s3 = inlined_call_operand.hbm [shape: f32[2,256,256], index: 3, kind: output, shape index: {}]  }
   0x1   :  { %10 = vsyncpa [#allocation3 + $0x1], 0 }
   0x2   :  { %11 = vsyncpa [#allocation6], 0 }
   0x3   :  { %12 = vsyncpa [#allocation4], 0 }
   0x4   :  { %14 = vsyncpa [#allocation4 + $0x1], 0  ;;  %s1191_s12 = smov 0   ;;  %s1193_s13 = smov 0  }
   0x5   :  { %s1195_s14 = smov 0   ;;  %s1197_s15 = smov 0  }
   0x6   :  { %s1199_s16 = smov 0   ;;  %s1201_s17 = smov 0  }
   0x7 LB: > { %s864_s18 = sadd.s32 4294967295, %s1161_s17   ;;  %s865_s19 = sadd.s32 4294967294, %s1161_s17   ;;  %s1161_s17 = sphi %s1201_s17, %s20_s17   ;;  %s1157_s16 = sphi %s1199_s16, %s1664_s16   ;;  %s1153_s15 = sphi %s1197_s15, %s1663_s15   ;;  %s1149_s14 = sphi %s1195_s14, %s1662_s14   ;;  %s1145_s13 = sphi %s1193_s13, %s1661_s13   ;;  %s1141_s12 = sphi %s1191_s12, %s1660_s12  }
   0x8   : > { %p54_p0 = scmp.ne.s32.totalorder %s1145_s13, %s1141_s12  ;;  %p1225_p1 = scmp.eq.s32.totalorder %s864_s18, 0 }
   0x9   : > { %p1229_p2 = scmp.eq.s32.totalorder %s864_s18, 1  ;;  %p128_p3 = scmp.eq.s32.totalorder %s865_s19, 1 }
   0xa   : > { %s1645_s20 = scalar_select %p1225_p1, 1, 0 }
   0xb   : > { %s1646_s21 = scalar_select %p1229_p2, 1, 0 }
   0xc   : > { %p1235_p4 = por %p1225_p1, %p54_p0  ;;  %p866_p5 = scmp.ge.s32.totalorder %s1161_s17, 1 }
   0xd   : > { %p1240_p6 = por %p128_p3, %p54_p0  ;;  %p135_p7 = scmp.lt.s32.totalorder %s1161_s17, 3 }
   0xe   : > { %s1647_s22 = scalar_select %p1235_p4, 1, 0 }
   0xf   : > { %s1648_s23 = scalar_select %p1240_p6, 1, 0 }
  0x10   : > { %p1245_p8 = pnand %p866_p5, %p135_p7  ;;  %s1163_s25 = smov [#allocation5]  }
  0x11   : > { %s147_s26 = sshll.u32 %s1163_s25, 4  ;;  %s32_s28 = sadd.s32 1, %s1157_s16  ;;  %s148_s26 = int_to_ptr.vmem [resolvable:$true] %s147_s26 }
  0x12   : > { %s1649_s24 = scalar_select %p1245_p8, 1, 0 }
  0x13   : > { %p947_p9 = pneg %p1245_p8  ;;  %s1017_s4 = scalar_lea.hbm %s1638_s1, 2048 }
  0x14   : > { %p1018_p12 = scmp.ne.s32.totalorder %s1638_s1, %s1017_s4  ;;  %p1024_p5 = scmp.lt.u32.totalorder %s1017_s4, %s1638_s1 }
  0x15   : > { %p1254_p11 = pnand %p947_p9, %p1225_p1 }
  0x17   : > { %p1019_p13 = pneg %p1254_p11 }
  0x19   : > { %p1020_p0 = pnand %p1019_p13, %p1018_p12 }
  0x1b   : > { %p1021_p3 = pneg %p1020_p0 }
  0x1d   : > { %p1026_p7 = pnand %p1024_p5, %p1021_p3 }
  0x1f   : > { %1029 = shalt.err (!%p1026_p7)
}
  0x20   : > { %s1030_s9 = scalar_lea.vmem %s148_s26, 2048  ;;  %p1038_p1 = scmp.lt.s32.totalorder %s148_s26, %s148_s26 }
  0x21   : > { %p1031_p9 = scmp.ne.s32.totalorder %s148_s26, %s1030_s9  ;;  %p1039_p4 = scmp.lt.s32.totalorder %s1030_s9, %s1030_s9 }
  0x23   : > { %p1033_p10 = pnand %p1031_p9, %p1019_p13  ;;  %p1040_p8 = por %p1039_p4, %p1038_p1 }
  0x25   : > { %p1034_p6 = pneg %p1033_p10 }
  0x27   : > { %p1041_p2 = pnand %p1040_p8, %p1034_p6 }
  0x29   : > { %1044 = shalt.err (!%p1041_p2)
}
  0x2a   : > { %s1164_s10 = smov 256   ;;  %s1165_s11 = smov 16  }
  0x2b   : > { %950 = dma.hbm_to_vmem [thread:$0]  (!%p1254_p11), %s1638_s1, 2048, %s148_s26, [#allocation6], %s1164_s10, %s1164_s10, %s1165_s11  }
  0x2c   : > { %p34_p1 = scmp.ge.s32.totalorder %s32_s28, 2  ;;  %s41_s25 = sadd.s32 1, %s1149_s14 }
  0x2d   : > { %p48_p2 = scmp.ne.s32.totalorder %s1149_s14, %s1145_s13  ;;  %p49_p4 = scmp.eq.s32.totalorder %s1161_s17, 0 }
  0x2e   : > { %s1666_s28 = smov (%p34_p1, %s32_s28), 0  ;;  %p1652_p8 = scmp.ne.s32.totalorder %s1646_s21, 0 }
  0x2f   : > { %p1284_p6 = por %p49_p4, %p48_p2  ;;  %s36_s30 = ssub.s32 %s1157_s16, %s1666_s28 }
  0x30   : > { %p1290_p10 = por %p1652_p8, %p48_p2  ;;  %p960_p12 = scmp.lt.s32.totalorder %s1161_s17, 2 }
  0x31   : > { %p39_p11 = scmp.eq.s32.totalorder %s36_s30, 0  ;;  %s164_s26 = sand.u32 1, %s1149_s14  }
  0x32   : > { %s869_s4 = sshll.u32 %s164_s26, 7  ;;  %s913_s6 = sshll.u32 %s1157_s16, 11 }
  0x33   : > { %s1299_s5 = scalar_select %p39_p11, %s1149_s14, %s41_s25  }
  0x34   : > { %s1305_s9 = scalar_lea.hbm %s1637_s0, %s913_s6  ;;  %s168_s21 = scalar_lea.vmem [#allocation2], %s869_s4 }
  0x35   : > { %s177_s18 = sshll.u32 %s168_s21, 4  ;;  %p1311_p13 = pnand %p960_p12, %p1284_p6  ;;  %s1307_s18 = int_to_ptr.vmem [resolvable:$true] %s177_s18 }
  0x36   : > { %s1315_s25 = scalar_lea.sflag [#allocation3], %s164_s26  ;;  %s1045_s30 = scalar_lea.hbm %s1305_s9, 2048 }
  0x37   : > { %p1046_p0 = scmp.ne.s32.totalorder %s1305_s9, %s1045_s30  ;;  %p1047_p3 = pneg %p1311_p13 }
  0x38   : > { %s1050_s29 = scalar_lea.hbm %s1637_s0, 4096  ;;  %p1051_p9 = scmp.lt.u32.totalorder %s1305_s9, %s1637_s0 }
  0x39   : > { %p1048_p5 = pnand %p1047_p3, %p1046_p0  ;;  %p1052_p1 = scmp.lt.u32.totalorder %s1050_s29, %s1045_s30 }
  0x3a   : > { %p1054_p4 = scmp.lt.u32.totalorder %s1045_s30, %s1305_s9 }
  0x3b   : > { %p1049_p7 = pneg %p1048_p5  ;;  %p1053_p2 = por %p1052_p1, %p1051_p9 }
  0x3d   : > { %p1055_p6 = por %p1054_p4, %p1053_p2 }
  0x3f   : > { %p1056_p8 = pnand %p1055_p6, %p1049_p7 }
  0x41   : > { %1059 = shalt.err (!%p1056_p8)
}
  0x42   : > { %s1060_s26 = scalar_lea.vmem %s1307_s18, 2048  ;;  %s1166_s21 = smov [#allocation2]  }
  0x43   : > { %p1061_p12 = scmp.ne.s32.totalorder %s1307_s18, %s1060_s26  ;;  %s1065_s4 = sshll.u32 %s1166_s21, 4  ;;  %s1066_s4 = int_to_ptr.vmem [resolvable:$false] %s1065_s4 }
  0x44   : > { %s1067_s6 = scalar_lea.vmem %s1066_s4, 4096  ;;  %p1068_p5 = scmp.lt.s32.totalorder %s1307_s18, %s1066_s4 }
  0x45   : > { %p1063_p11 = pnand %p1061_p12, %p1047_p3  ;;  %p1069_p9 = scmp.lt.s32.totalorder %s1067_s6, %s1060_s26 }
  0x47   : > { %p1064_p0 = pneg %p1063_p11  ;;  %p1070_p1 = por %p1069_p9, %p1068_p5 }
  0x49   : > { %p1071_p2 = pnand %p1070_p1, %p1064_p0 }
  0x4b   : > { %1074 = shalt.err (!%p1071_p2)
}
  0x4c   : > { %954 = dma.hbm_to_vmem [thread:$0]  (!%p1311_p13), %s1305_s9, 2048, %s1307_s18, %s1315_s25, %s1164_s10, %s1164_s10, %s1165_s11  }
  0x4d   : > { %p1655_p3 = scmp.ne.s32.totalorder %s1649_s24, 0 }
  0x4e   : > { %s1349_s30 = sand.u32 (!%p1655_p3), 1, %s1145_s13   ;;  %p1656_p7 = scmp.ne.s32.totalorder (!%p1655_p3), %s1647_s22, 0 }
  0x4f   : > { %189 = sbr.rel (%p1655_p3) target bundleno = 511 (0x1ff), region = 32  ;;  %s873_s29 = sshll.u32 (!%p1655_p3), %s1349_s30, 7 }
  0x50   : > { %s192_s7 = scalar_lea.sflag (!%p1655_p3), [#allocation3], %s1349_s30  ;;  %s1353_s8 = scalar_lea.vmem (!%p1655_p3), [#allocation2], %s873_s29 }
  0x56   : > { %1128 = dma.done.wait (%p1656_p7), %s192_s7, 2048  }
  0x57   : > { %1130 = vsyncadd (%p1656_p7), %s192_s7, 4294965248  ;;  %p1657_p13 = scmp.ne.s32.totalorder %s1645_s20, 0 }
  0x59   : > { %1132 = dma.done.wait (%p1657_p13), [#allocation6], 2048  }
  0x5a   : > { %1134 = vsyncadd (%p1657_p13), [#allocation6], 4294965248  ;;  %v1167_v0 = vmov 0.0   ;;  %v225_v1 = vld [vmem:[%s1353_s8 + $0x8] sm:$0xff]  ;;  %v224_v2 = vld [vmem:[%s1353_s8] sm:$0xff]  ;;  %vm332_vm0 = vcmask 523264  }
  0x5b   : > { %493 = vmatprep.mubr.f32.mxu0 %v1167_v0  ;;  %589 = vmatprep.mubr.f32.mxu1 %v1167_v0  ;;  %v227_v3 = vld [vmem:[%s1353_s8 + $0x18] sm:$0xff]  ;;  %v226_v4 = vld [vmem:[%s1353_s8 + $0x10] sm:$0xff]  ;;  %v229_v5 = vld [vmem:[%s1353_s8 + $0x28] sm:$0xff]  ;;  %s875_s24 = sshll.u32 %s1349_s30, 9  ;;  %s914_s11 = sshll.u32 %s1153_s15, 13 }
  0x5c   : > { %300 = vxpose.xlu1.b32.start [1/8] (short) %v225_v1, 128  ;;  %268 = vxpose.xlu0.b32.start [1/8] (short) %v224_v2, 128  ;;  %v228_v6 = vld [vmem:[%s1353_s8 + $0x20] sm:$0xff]  ;;  %v241_v7 = vld [vmem:[#allocation5 + $0x8] sm:$0xff]  ;;  %v243_v8 = vld [vmem:[#allocation5 + $0x18] sm:$0xff]  ;;  %s1455_s10 = scalar_lea.vmem [#allocation7], %s875_s24  ;;  %s1580_s19 = scalar_lea.hbm %s1640_s3, %s914_s11 }
  0x5d   : > { %v915_v9 = vpack.c.bf16 %v243_v8, %v241_v7  ;;  %v240_v10 = vld [vmem:[#allocation5] sm:$0xff]  ;;  %v242_v11 = vld [vmem:[#allocation5 + $0x10] sm:$0xff]  ;;  %v245_v12 = vld [vmem:[#allocation5 + $0x28] sm:$0xff]  ;;  %s767_s9 = sshll.u32 %s1455_s10, 4  ;;  %s751_s25 = scalar_lea.sflag [#allocation4], %s1349_s30  ;;  %s1582_s9 = int_to_ptr.vmem [resolvable:$true] %s767_s9 }
  0x5e   : > { %v917_v13 = vpack.c.bf16 %v242_v11, %v240_v10  ;;  %v247_v14 = vld [vmem:[#allocation5 + $0x38] sm:$0xff]  ;;  %v244_v15 = vld [vmem:[#allocation5 + $0x20] sm:$0xff]  ;;  %v246_v16 = vld [vmem:[#allocation5 + $0x30] sm:$0xff]  ;;  %v258_v10 = vlaneseq  ;;  %s1075_s26 = scalar_lea.vmem %s1582_s9, 8192  ;;  %s1168_s21 = smov [#allocation7]  }
  0x5f   : > { %916 = vmatprep.subr.bf16.mxu0 %v915_v9  ;;  %931 = vmatprep.subr.bf16.mxu1 %v915_v9  ;;  %v919_v17 = vpack.c.bf16 %v247_v14, %v245_v12  ;;  %v249_v18 = vld [vmem:[#allocation5 + $0x48] sm:$0xff]  ;;  %v251_v19 = vld [vmem:[#allocation5 + $0x58] sm:$0xff]  ;;  %v230_v21 = vld [vmem:[%s1353_s8 + $0x30] sm:$0xff]  ;;  %v921_v22 = vpack.c.bf16 %v246_v16, %v244_v15  ;;  %p1076_p4 = scmp.ne.s32.totalorder %s1582_s9, %s1075_s26  ;;  %s1079_s4 = sshll.u32 %s1168_s21, 4  ;;  %s1080_s4 = int_to_ptr.vmem [resolvable:$false] %s1079_s4 }
  0x60   : > { %301 = vxpose.xlu1.b32.cont [2/8] (short) %v227_v3, 128  ;;  %269 = vxpose.xlu0.b32.cont [2/8] (short) %v226_v4, 128  ;;  %v231_v20 = vld [vmem:[%s1353_s8 + $0x38] sm:$0xff]  ;;  %v923_v23 = vpack.c.bf16 %v251_v19, %v249_v18  ;;  %v248_v24 = vld [vmem:[#allocation5 + $0x40] sm:$0xff]  ;;  %v250_v25 = vld [vmem:[#allocation5 + $0x50] sm:$0xff]  ;;  %v259_v11 = vshrl.u32 %v258_v10, 7  ;;  %s1081_s6 = scalar_lea.vmem %s1080_s4, 16384  ;;  %p1082_p12 = scmp.lt.s32.totalorder %s1582_s9, %s1080_s4 }
  0x61   : > { %918 = vmatpush1.bf16.msra.mxu0 %v917_v13  ;;  %935 = vmatpush1.bf16.msra.mxu1 %v917_v13  ;;  %v253_v26 = vld [vmem:[#allocation5 + $0x68] sm:$0xff]  ;;  %v255_v27 = vld [vmem:[#allocation5 + $0x78] sm:$0xff]  ;;  %v232_v29 = vld [vmem:[%s1353_s8 + $0x40] sm:$0xff]  ;;  %v925_v30 = vpack.c.bf16 %v250_v25, %v248_v24  ;;  %p1077_p6 = pnand %p1076_p4, %p1290_p10  ;;  %p1083_p11 = scmp.lt.s32.totalorder %s1081_s6, %s1075_s26 }
  0x62   : > { %920 = vmatprep.subr.bf16.mxu0 %v919_v17  ;;  %932 = vmatprep.subr.bf16.mxu1 %v919_v17  ;;  %v233_v28 = vld [vmem:[%s1353_s8 + $0x48] sm:$0xff]  ;;  %v927_v31 = vpack.c.bf16 %v255_v27, %v253_v26  ;;  %v252_v32 = vld [vmem:[#allocation5 + $0x60] sm:$0xff]  ;;  %v254_v33 = vld [vmem:[#allocation5 + $0x70] sm:$0xff]  ;;  %v260_v12 = vsub.s32 0, %v259_v11  ;;  %v264_v14 = vsub.s32 1, %v259_v11 }
  0x63   : > { %v235_v34 = vld [vmem:[%s1353_s8 + $0x58] sm:$0xff]  ;;  %v234_v35 = vld [vmem:[%s1353_s8 + $0x50] sm:$0xff]  ;;  %v929_v36 = vpack.c.bf16 %v254_v33, %v252_v32  ;;  %v237_v37 = vld [vmem:[%s1353_s8 + $0x68] sm:$0xff]  ;;  %p1078_p8 = pneg %p1077_p6  ;;  %p1084_p0 = por %p1083_p11, %p1082_p12 }
  0x64   : > { %302 = vxpose.xlu1.b32.cont [3/8] (short) %v229_v5, 128  ;;  %270 = vxpose.xlu0.b32.cont [3/8] (short) %v228_v6, 128  ;;  %v236_v38 = vld [vmem:[%s1353_s8 + $0x60] sm:$0xff]  ;;  %v239_v39 = vld [vmem:[%s1353_s8 + $0x78] sm:$0xff]  ;;  %v238_v40 = vld [vmem:[%s1353_s8 + $0x70] sm:$0xff] }
  0x65   : > { %922 = vmatpush1.bf16.msra.mxu0 %v921_v22  ;;  %936 = vmatpush1.bf16.msra.mxu1 %v921_v22  ;;  %v256_v13 = vld [vmem:[%s1639_s2] sm:$0x3]  ;;  %p1085_p5 = pnand %p1084_p0, %p1078_p8 }
  0x66   : > { %924 = vmatprep.subr.bf16.mxu0 %v923_v23  ;;  %933 = vmatprep.subr.bf16.mxu1 %v923_v23  ;;  %v1447_v15 = vrot.slane %v256_v13, %v260_v12  ;;  %v1449_v16 = vrot.slane %v256_v13, %v264_v14 }
  0x68   : > { %303 = vxpose.xlu1.b32.cont [4/8] (short) %v231_v20, 128  ;;  %271 = vxpose.xlu0.b32.cont [4/8] (short) %v230_v21, 128 }
  0x69   : > { %926 = vmatpush1.bf16.msra.mxu0 %v925_v30  ;;  %937 = vmatpush1.bf16.msra.mxu1 %v925_v30 }
  0x6a   : > { %928 = vmatprep.subr.bf16.mxu0 %v927_v31  ;;  %934 = vmatprep.subr.bf16.mxu1 %v927_v31 }
  0x6c   : > { %304 = vxpose.xlu1.b32.cont [5/8] (short) %v233_v28, 128  ;;  %272 = vxpose.xlu0.b32.cont [5/8] (short) %v232_v29, 128 }
  0x6d   : > { %930 = vmatpush1.bf16.msra.mxu0 %v929_v36  ;;  %938 = vmatpush1.bf16.msra.mxu1 %v929_v36 }
  0x70   : > { %305 = vxpose.xlu1.b32.cont [6/8] (short) %v235_v34, 128  ;;  %273 = vxpose.xlu0.b32.cont [6/8] (short) %v234_v35, 128 }
  0x74   : > { %306 = vxpose.xlu1.b32.cont [7/8] (short) %v237_v37, 128  ;;  %274 = vxpose.xlu0.b32.cont [7/8] (short) %v236_v38, 128 }
  0x78   : > { %307 = vxpose.xlu1.b32.end [8/8] (short) %v239_v39, 128  ;;  %275 = vxpose.xlu0.b32.end [8/8] (short) %v238_v40, 128 }
  0xdc   : > { %v316_v41 = vpop.trf.xlu1  ;;  %v284_v42 = vpop.trf.xlu0 }
  0xdd   : > { %876 = vmatmul.mubr.msk.f32.vlgmr.msra.gmra.mrb[0].mxu0 %vm332_vm0, %v284_v42  ;;  %892 = vmatmul.mubr.msk.f32.vlgmr.msra.gmra.mrb[0].mxu1 %vm332_vm0, %v316_v41 }
  0xde   : > { %595 = vmatprep.mubr.f32.mxu1 %v1167_v0  ;;  %499 = vmatprep.mubr.f32.mxu0 %v1167_v0 }
  0xe0   : > { %v317_v43 = vpop.trf.xlu1  ;;  %v285_v44 = vpop.trf.xlu0 }
  0xe1   : > { %877 = vmatmul.mubr.msk.f32.gmra.mrb[2].mxu0 %vm332_vm0, %v285_v44  ;;  %893 = vmatmul.mubr.msk.f32.gmra.mrb[2].mxu1 %vm332_vm0, %v317_v43 }
  0xe2   : > { %601 = vmatprep.mubr.f32.mxu1 %v1167_v0  ;;  %505 = vmatprep.mubr.f32.mxu0 %v1167_v0 }
  0xe4   : > { %v318_v45 = vpop.trf.xlu1  ;;  %v286_v46 = vpop.trf.xlu0 }
  0xe5   : > { %878 = vmatmul.mubr.msk.f32.gmra.mrb[4].mxu0 %vm332_vm0, %v286_v46  ;;  %894 = vmatmul.mubr.msk.f32.gmra.mrb[4].mxu1 %vm332_vm0, %v318_v45 }
  0xe6   : > { %607 = vmatprep.mubr.f32.mxu1 %v1167_v0  ;;  %511 = vmatprep.mubr.f32.mxu0 %v1167_v0 }
  0xe8   : > { %v319_v47 = vpop.trf.xlu1  ;;  %v287_v48 = vpop.trf.xlu0 }
  0xe9   : > { %879 = vmatmul.mubr.msk.f32.gmra.mrb[6].mxu0 %vm332_vm0, %v287_v48  ;;  %895 = vmatmul.mubr.msk.f32.gmra.mrb[6].mxu1 %vm332_vm0, %v319_v47 }
  0xea   : > { %613 = vmatprep.mubr.f32.mxu1 %v1167_v0  ;;  %517 = vmatprep.mubr.f32.mxu0 %v1167_v0 }
  0xec   : > { %v320_v49 = vpop.trf.xlu1  ;;  %v288_v50 = vpop.trf.xlu0 }
  0xed   : > { %880 = vmatmul.mubr.msk.f32.gmra.mrb[8].mxu0 %vm332_vm0, %v288_v50  ;;  %896 = vmatmul.mubr.msk.f32.gmra.mrb[8].mxu1 %vm332_vm0, %v320_v49 }
  0xee   : > { %619 = vmatprep.mubr.f32.mxu1 %v1167_v0  ;;  %523 = vmatprep.mubr.f32.mxu0 %v1167_v0 }
  0xf0   : > { %v321_v51 = vpop.trf.xlu1  ;;  %v289_v52 = vpop.trf.xlu0 }
  0xf1   : > { %881 = vmatmul.mubr.msk.f32.gmra.mrb[10].mxu0 %vm332_vm0, %v289_v52  ;;  %897 = vmatmul.mubr.msk.f32.gmra.mrb[10].mxu1 %vm332_vm0, %v321_v51 }
  0xf2   : > { %625 = vmatprep.mubr.f32.mxu1 %v1167_v0  ;;  %529 = vmatprep.mubr.f32.mxu0 %v1167_v0 }
  0xf4   : > { %v322_v53 = vpop.trf.xlu1  ;;  %v290_v54 = vpop.trf.xlu0 }
  0xf5   : > { %882 = vmatmul.mubr.msk.f32.gmra.mrb[12].mxu0 %vm332_vm0, %v290_v54  ;;  %898 = vmatmul.mubr.msk.f32.gmra.mrb[12].mxu1 %vm332_vm0, %v322_v53 }
  0xf6   : > { %631 = vmatprep.mubr.f32.mxu1 %v1167_v0  ;;  %535 = vmatprep.mubr.f32.mxu0 %v1167_v0 }
  0xf8   : > { %v323_v55 = vpop.trf.xlu1  ;;  %v291_v56 = vpop.trf.xlu0 }
  0xf9   : > { %883 = vmatmul.mubr.msk.f32.gmra.mrb[14].mxu0 %vm332_vm0, %v291_v56  ;;  %899 = vmatmul.mubr.msk.f32.gmra.mrb[14].mxu1 %vm332_vm0, %v323_v55 }
  0xfa   : > { %637 = vmatprep.mubr.f32.mxu1 %v1167_v0  ;;  %541 = vmatprep.mubr.f32.mxu0 %v1167_v0 }
  0xfc   : > { %v324_v57 = vpop.trf.xlu1  ;;  %v292_v58 = vpop.trf.xlu0 }
  0xfd   : > { %884 = vmatmul.mubr.msk.f32.gmra.mrb[16].mxu0 %vm332_vm0, %v292_v58  ;;  %900 = vmatmul.mubr.msk.f32.gmra.mrb[16].mxu1 %vm332_vm0, %v324_v57 }
  0xfe   : > { %643 = vmatprep.mubr.f32.mxu1 %v1167_v0  ;;  %547 = vmatprep.mubr.f32.mxu0 %v1167_v0 }
 0x100   : > { %v325_v59 = vpop.trf.xlu1  ;;  %v293_v60 = vpop.trf.xlu0 }
 0x101   : > { %885 = vmatmul.mubr.msk.f32.gmra.mrb[18].mxu0 %vm332_vm0, %v293_v60  ;;  %901 = vmatmul.mubr.msk.f32.gmra.mrb[18].mxu1 %vm332_vm0, %v325_v59 }
 0x102   : > { %649 = vmatprep.mubr.f32.mxu1 %v1167_v0  ;;  %553 = vmatprep.mubr.f32.mxu0 %v1167_v0 }
 0x104   : > { %v326_v61 = vpop.trf.xlu1  ;;  %v294_v62 = vpop.trf.xlu0 }
 0x105   : > { %886 = vmatmul.mubr.msk.f32.gmra.mrb[20].mxu0 %vm332_vm0, %v294_v62  ;;  %902 = vmatmul.mubr.msk.f32.gmra.mrb[20].mxu1 %vm332_vm0, %v326_v61 }
 0x106   : > { %655 = vmatprep.mubr.f32.mxu1 %v1167_v0  ;;  %559 = vmatprep.mubr.f32.mxu0 %v1167_v0 }
 0x108   : > { %v327_v63 = vpop.trf.xlu1  ;;  %v295_v1 = vpop.trf.xlu0 }
 0x109   : > { %887 = vmatmul.mubr.msk.f32.gmra.mrb[22].mxu0 %vm332_vm0, %v295_v1  ;;  %903 = vmatmul.mubr.msk.f32.gmra.mrb[22].mxu1 %vm332_vm0, %v327_v63 }
 0x10a   : > { %661 = vmatprep.mubr.f32.mxu1 %v1167_v0  ;;  %565 = vmatprep.mubr.f32.mxu0 %v1167_v0 }
 0x10c   : > { %v328_v2 = vpop.trf.xlu1  ;;  %v296_v3 = vpop.trf.xlu0 }
 0x10d   : > { %888 = vmatmul.mubr.msk.f32.gmra.mrb[24].mxu0 %vm332_vm0, %v296_v3  ;;  %904 = vmatmul.mubr.msk.f32.gmra.mrb[24].mxu1 %vm332_vm0, %v328_v2 }
 0x10e   : > { %667 = vmatprep.mubr.f32.mxu1 %v1167_v0  ;;  %571 = vmatprep.mubr.f32.mxu0 %v1167_v0 }
 0x110   : > { %v329_v4 = vpop.trf.xlu1  ;;  %v297_v5 = vpop.trf.xlu0 }
 0x111   : > { %889 = vmatmul.mubr.msk.f32.gmra.mrb[26].mxu0 %vm332_vm0, %v297_v5  ;;  %905 = vmatmul.mubr.msk.f32.gmra.mrb[26].mxu1 %vm332_vm0, %v329_v4 }
 0x112   : > { %673 = vmatprep.mubr.f32.mxu1 %v1167_v0  ;;  %577 = vmatprep.mubr.f32.mxu0 %v1167_v0 }
 0x114   : > { %v330_v6 = vpop.trf.xlu1  ;;  %v298_v7 = vpop.trf.xlu0 }
 0x115   : > { %890 = vmatmul.mubr.msk.f32.gmra.mrb[28].mxu0 %vm332_vm0, %v298_v7  ;;  %906 = vmatmul.mubr.msk.f32.gmra.mrb[28].mxu1 %vm332_vm0, %v330_v6 }
 0x116   : > { %679 = vmatprep.mubr.f32.mxu1 %v1167_v0  ;;  %583 = vmatprep.mubr.f32.mxu0 %v1167_v0 }
 0x118   : > { %v331_v8 = vpop.trf.xlu1  ;;  %v299_v9 = vpop.trf.xlu0 }
 0x119   : > { %891 = vmatmul.mubr.msk.f32.gmra.mrb[30].mxu0 %vm332_vm0, %v299_v9  ;;  %907 = vmatmul.mubr.msk.f32.gmra.mrb[30].mxu1 %vm332_vm0, %v331_v8 }
 0x1b0   : > { %v495_v0 = vpop.f32.mrb[0].mxu0  ;;  %v591_v17 = vpop.f32.mrb[0].mxu1 }
 0x1b1   : > { %v496_v18 = vadd.f32 %v495_v0, %v1447_v15  ;;  %v592_v19 = vadd.f32 %v591_v17, %v1447_v15  ;;  %v497_v20 = vpop.f32.mrb[1].mxu0  ;;  %v593_v21 = vpop.f32.mrb[1].mxu1 }
 0x1b2   : > { %v498_v22 = vadd.f32 %v497_v20, %v1449_v16  ;;  %v594_v23 = vadd.f32 %v593_v21, %v1449_v16 }
 0x1b3   : > { %686 = vst [vmem:[%s1455_s10] sm:$0xff] %v496_v18  ;;  %718 = vst [vmem:[%s1455_s10 + $0x100] sm:$0xff] %v592_v19 }
 0x1b4   : > { %687 = vst [vmem:[%s1455_s10 + $0x8] sm:$0xff] %v498_v22  ;;  %719 = vst [vmem:[%s1455_s10 + $0x108] sm:$0xff] %v594_v23  ;;  %v501_v24 = vpop.f32.mrb[2].mxu0  ;;  %v597_v25 = vpop.f32.mrb[2].mxu1 }
 0x1b5   : > { %v502_v26 = vadd.f32 %v501_v24, %v1447_v15  ;;  %v598_v27 = vadd.f32 %v597_v25, %v1447_v15  ;;  %v503_v28 = vpop.f32.mrb[3].mxu0  ;;  %v599_v29 = vpop.f32.mrb[3].mxu1 }
 0x1b6   : > { %v504_v30 = vadd.f32 %v503_v28, %v1449_v16  ;;  %v600_v31 = vadd.f32 %v599_v29, %v1449_v16 }
 0x1b7   : > { %688 = vst [vmem:[%s1455_s10 + $0x10] sm:$0xff] %v502_v26  ;;  %720 = vst [vmem:[%s1455_s10 + $0x110] sm:$0xff] %v598_v27 }
 0x1b8   : > { %689 = vst [vmem:[%s1455_s10 + $0x18] sm:$0xff] %v504_v30  ;;  %721 = vst [vmem:[%s1455_s10 + $0x118] sm:$0xff] %v600_v31  ;;  %v507_v32 = vpop.f32.mrb[4].mxu0  ;;  %v603_v33 = vpop.f32.mrb[4].mxu1 }
 0x1b9   : > { %v508_v34 = vadd.f32 %v507_v32, %v1447_v15  ;;  %v604_v35 = vadd.f32 %v603_v33, %v1447_v15  ;;  %v509_v36 = vpop.f32.mrb[5].mxu0  ;;  %v605_v37 = vpop.f32.mrb[5].mxu1 }
 0x1ba   : > { %v510_v38 = vadd.f32 %v509_v36, %v1449_v16  ;;  %v606_v39 = vadd.f32 %v605_v37, %v1449_v16 }
 0x1bb   : > { %690 = vst [vmem:[%s1455_s10 + $0x20] sm:$0xff] %v508_v34  ;;  %722 = vst [vmem:[%s1455_s10 + $0x120] sm:$0xff] %v604_v35 }
 0x1bc   : > { %691 = vst [vmem:[%s1455_s10 + $0x28] sm:$0xff] %v510_v38  ;;  %723 = vst [vmem:[%s1455_s10 + $0x128] sm:$0xff] %v606_v39  ;;  %v513_v40 = vpop.f32.mrb[6].mxu0  ;;  %v609_v41 = vpop.f32.mrb[6].mxu1 }
 0x1bd   : > { %v514_v42 = vadd.f32 %v513_v40, %v1447_v15  ;;  %v610_v43 = vadd.f32 %v609_v41, %v1447_v15  ;;  %v515_v44 = vpop.f32.mrb[7].mxu0  ;;  %v611_v45 = vpop.f32.mrb[7].mxu1 }
 0x1be   : > { %v516_v46 = vadd.f32 %v515_v44, %v1449_v16  ;;  %v612_v47 = vadd.f32 %v611_v45, %v1449_v16 }
 0x1bf   : > { %692 = vst [vmem:[%s1455_s10 + $0x30] sm:$0xff] %v514_v42  ;;  %724 = vst [vmem:[%s1455_s10 + $0x130] sm:$0xff] %v610_v43 }
 0x1c0   : > { %693 = vst [vmem:[%s1455_s10 + $0x38] sm:$0xff] %v516_v46  ;;  %725 = vst [vmem:[%s1455_s10 + $0x138] sm:$0xff] %v612_v47  ;;  %v519_v48 = vpop.f32.mrb[8].mxu0  ;;  %v615_v49 = vpop.f32.mrb[8].mxu1 }
 0x1c1   : > { %v520_v50 = vadd.f32 %v519_v48, %v1447_v15  ;;  %v616_v51 = vadd.f32 %v615_v49, %v1447_v15  ;;  %v521_v52 = vpop.f32.mrb[9].mxu0  ;;  %v617_v53 = vpop.f32.mrb[9].mxu1 }
 0x1c2   : > { %v522_v54 = vadd.f32 %v521_v52, %v1449_v16  ;;  %v618_v55 = vadd.f32 %v617_v53, %v1449_v16 }
 0x1c3   : > { %694 = vst [vmem:[%s1455_s10 + $0x40] sm:$0xff] %v520_v50  ;;  %726 = vst [vmem:[%s1455_s10 + $0x140] sm:$0xff] %v616_v51 }
 0x1c4   : > { %695 = vst [vmem:[%s1455_s10 + $0x48] sm:$0xff] %v522_v54  ;;  %727 = vst [vmem:[%s1455_s10 + $0x148] sm:$0xff] %v618_v55  ;;  %v525_v56 = vpop.f32.mrb[10].mxu0  ;;  %v621_v57 = vpop.f32.mrb[10].mxu1 }
 0x1c5   : > { %v526_v58 = vadd.f32 %v525_v56, %v1447_v15  ;;  %v622_v59 = vadd.f32 %v621_v57, %v1447_v15  ;;  %v527_v60 = vpop.f32.mrb[11].mxu0  ;;  %v623_v61 = vpop.f32.mrb[11].mxu1 }
 0x1c6   : > { %v528_v62 = vadd.f32 %v527_v60, %v1449_v16  ;;  %v624_v63 = vadd.f32 %v623_v61, %v1449_v16 }
 0x1c7   : > { %696 = vst [vmem:[%s1455_s10 + $0x50] sm:$0xff] %v526_v58  ;;  %728 = vst [vmem:[%s1455_s10 + $0x150] sm:$0xff] %v622_v59 }
 0x1c8   : > { %697 = vst [vmem:[%s1455_s10 + $0x58] sm:$0xff] %v528_v62  ;;  %729 = vst [vmem:[%s1455_s10 + $0x158] sm:$0xff] %v624_v63  ;;  %v531_v1 = vpop.f32.mrb[12].mxu0  ;;  %v627_v2 = vpop.f32.mrb[12].mxu1 }
 0x1c9   : > { %v532_v3 = vadd.f32 %v531_v1, %v1447_v15  ;;  %v628_v4 = vadd.f32 %v627_v2, %v1447_v15  ;;  %v533_v5 = vpop.f32.mrb[13].mxu0  ;;  %v629_v6 = vpop.f32.mrb[13].mxu1 }
 0x1ca   : > { %v534_v7 = vadd.f32 %v533_v5, %v1449_v16  ;;  %v630_v8 = vadd.f32 %v629_v6, %v1449_v16 }
 0x1cb   : > { %698 = vst [vmem:[%s1455_s10 + $0x60] sm:$0xff] %v532_v3  ;;  %730 = vst [vmem:[%s1455_s10 + $0x160] sm:$0xff] %v628_v4 }
 0x1cc   : > { %699 = vst [vmem:[%s1455_s10 + $0x68] sm:$0xff] %v534_v7  ;;  %731 = vst [vmem:[%s1455_s10 + $0x168] sm:$0xff] %v630_v8  ;;  %v537_v9 = vpop.f32.mrb[14].mxu0  ;;  %v633_v10 = vpop.f32.mrb[14].mxu1 }
 0x1cd   : > { %v538_v11 = vadd.f32 %v537_v9, %v1447_v15  ;;  %v634_v12 = vadd.f32 %v633_v10, %v1447_v15  ;;  %v539_v13 = vpop.f32.mrb[15].mxu0  ;;  %v635_v14 = vpop.f32.mrb[15].mxu1 }
 0x1ce   : > { %v540_v0 = vadd.f32 %v539_v13, %v1449_v16  ;;  %v636_v17 = vadd.f32 %v635_v14, %v1449_v16 }
 0x1cf   : > { %700 = vst [vmem:[%s1455_s10 + $0x70] sm:$0xff] %v538_v11  ;;  %732 = vst [vmem:[%s1455_s10 + $0x170] sm:$0xff] %v634_v12 }
 0x1d0   : > { %701 = vst [vmem:[%s1455_s10 + $0x78] sm:$0xff] %v540_v0  ;;  %733 = vst [vmem:[%s1455_s10 + $0x178] sm:$0xff] %v636_v17  ;;  %v543_v18 = vpop.f32.mrb[16].mxu0  ;;  %v639_v19 = vpop.f32.mrb[16].mxu1 }
 0x1d1   : > { %v544_v20 = vadd.f32 %v543_v18, %v1447_v15  ;;  %v640_v21 = vadd.f32 %v639_v19, %v1447_v15  ;;  %v545_v22 = vpop.f32.mrb[17].mxu0  ;;  %v641_v23 = vpop.f32.mrb[17].mxu1 }
 0x1d2   : > { %v546_v24 = vadd.f32 %v545_v22, %v1449_v16  ;;  %v642_v25 = vadd.f32 %v641_v23, %v1449_v16 }
 0x1d3   : > { %702 = vst [vmem:[%s1455_s10 + $0x80] sm:$0xff] %v544_v20  ;;  %734 = vst [vmem:[%s1455_s10 + $0x180] sm:$0xff] %v640_v21 }
 0x1d4   : > { %703 = vst [vmem:[%s1455_s10 + $0x88] sm:$0xff] %v546_v24  ;;  %735 = vst [vmem:[%s1455_s10 + $0x188] sm:$0xff] %v642_v25  ;;  %v549_v26 = vpop.f32.mrb[18].mxu0  ;;  %v645_v27 = vpop.f32.mrb[18].mxu1 }
 0x1d5   : > { %v550_v28 = vadd.f32 %v549_v26, %v1447_v15  ;;  %v646_v29 = vadd.f32 %v645_v27, %v1447_v15  ;;  %v551_v30 = vpop.f32.mrb[19].mxu0  ;;  %v647_v31 = vpop.f32.mrb[19].mxu1 }
 0x1d6   : > { %v552_v32 = vadd.f32 %v551_v30, %v1449_v16  ;;  %v648_v33 = vadd.f32 %v647_v31, %v1449_v16 }
 0x1d7   : > { %704 = vst [vmem:[%s1455_s10 + $0x90] sm:$0xff] %v550_v28  ;;  %736 = vst [vmem:[%s1455_s10 + $0x190] sm:$0xff] %v646_v29 }
 0x1d8   : > { %705 = vst [vmem:[%s1455_s10 + $0x98] sm:$0xff] %v552_v32  ;;  %737 = vst [vmem:[%s1455_s10 + $0x198] sm:$0xff] %v648_v33  ;;  %v555_v34 = vpop.f32.mrb[20].mxu0  ;;  %v651_v35 = vpop.f32.mrb[20].mxu1 }
 0x1d9   : > { %v556_v36 = vadd.f32 %v555_v34, %v1447_v15  ;;  %v652_v37 = vadd.f32 %v651_v35, %v1447_v15  ;;  %v557_v38 = vpop.f32.mrb[21].mxu0  ;;  %v653_v39 = vpop.f32.mrb[21].mxu1 }
 0x1da   : > { %v558_v40 = vadd.f32 %v557_v38, %v1449_v16  ;;  %v654_v41 = vadd.f32 %v653_v39, %v1449_v16 }
 0x1db   : > { %706 = vst [vmem:[%s1455_s10 + $0xa0] sm:$0xff] %v556_v36  ;;  %738 = vst [vmem:[%s1455_s10 + $0x1a0] sm:$0xff] %v652_v37 }
 0x1dc   : > { %707 = vst [vmem:[%s1455_s10 + $0xa8] sm:$0xff] %v558_v40  ;;  %739 = vst [vmem:[%s1455_s10 + $0x1a8] sm:$0xff] %v654_v41  ;;  %v561_v42 = vpop.f32.mrb[22].mxu0  ;;  %v657_v43 = vpop.f32.mrb[22].mxu1 }
 0x1dd   : > { %v562_v44 = vadd.f32 %v561_v42, %v1447_v15  ;;  %v658_v45 = vadd.f32 %v657_v43, %v1447_v15  ;;  %v563_v46 = vpop.f32.mrb[23].mxu0  ;;  %v659_v47 = vpop.f32.mrb[23].mxu1 }
 0x1de   : > { %v564_v48 = vadd.f32 %v563_v46, %v1449_v16  ;;  %v660_v49 = vadd.f32 %v659_v47, %v1449_v16 }
 0x1df   : > { %708 = vst [vmem:[%s1455_s10 + $0xb0] sm:$0xff] %v562_v44  ;;  %740 = vst [vmem:[%s1455_s10 + $0x1b0] sm:$0xff] %v658_v45 }
 0x1e0   : > { %709 = vst [vmem:[%s1455_s10 + $0xb8] sm:$0xff] %v564_v48  ;;  %741 = vst [vmem:[%s1455_s10 + $0x1b8] sm:$0xff] %v660_v49  ;;  %v567_v50 = vpop.f32.mrb[24].mxu0  ;;  %v663_v51 = vpop.f32.mrb[24].mxu1 }
 0x1e1   : > { %v568_v52 = vadd.f32 %v567_v50, %v1447_v15  ;;  %v664_v53 = vadd.f32 %v663_v51, %v1447_v15  ;;  %v569_v54 = vpop.f32.mrb[25].mxu0  ;;  %v665_v55 = vpop.f32.mrb[25].mxu1 }
 0x1e2   : > { %v570_v56 = vadd.f32 %v569_v54, %v1449_v16  ;;  %v666_v57 = vadd.f32 %v665_v55, %v1449_v16 }
 0x1e3   : > { %710 = vst [vmem:[%s1455_s10 + $0xc0] sm:$0xff] %v568_v52  ;;  %742 = vst [vmem:[%s1455_s10 + $0x1c0] sm:$0xff] %v664_v53 }
 0x1e4   : > { %711 = vst [vmem:[%s1455_s10 + $0xc8] sm:$0xff] %v570_v56  ;;  %743 = vst [vmem:[%s1455_s10 + $0x1c8] sm:$0xff] %v666_v57  ;;  %v573_v58 = vpop.f32.mrb[26].mxu0  ;;  %v669_v59 = vpop.f32.mrb[26].mxu1 }
 0x1e5   : > { %v574_v60 = vadd.f32 %v573_v58, %v1447_v15  ;;  %v670_v61 = vadd.f32 %v669_v59, %v1447_v15  ;;  %v575_v62 = vpop.f32.mrb[27].mxu0  ;;  %v671_v63 = vpop.f32.mrb[27].mxu1 }
 0x1e6   : > { %v576_v1 = vadd.f32 %v575_v62, %v1449_v16  ;;  %v672_v2 = vadd.f32 %v671_v63, %v1449_v16 }
 0x1e7   : > { %712 = vst [vmem:[%s1455_s10 + $0xd0] sm:$0xff] %v574_v60  ;;  %744 = vst [vmem:[%s1455_s10 + $0x1d0] sm:$0xff] %v670_v61 }
 0x1e8   : > { %713 = vst [vmem:[%s1455_s10 + $0xd8] sm:$0xff] %v576_v1  ;;  %745 = vst [vmem:[%s1455_s10 + $0x1d8] sm:$0xff] %v672_v2  ;;  %v579_v3 = vpop.f32.mrb[28].mxu0  ;;  %v675_v4 = vpop.f32.mrb[28].mxu1 }
 0x1e9   : > { %v580_v5 = vadd.f32 %v579_v3, %v1447_v15  ;;  %v676_v6 = vadd.f32 %v675_v4, %v1447_v15  ;;  %v581_v7 = vpop.f32.mrb[29].mxu0  ;;  %v677_v8 = vpop.f32.mrb[29].mxu1 }
 0x1ea   : > { %v582_v9 = vadd.f32 %v581_v7, %v1449_v16  ;;  %v678_v10 = vadd.f32 %v677_v8, %v1449_v16 }
 0x1eb   : > { %714 = vst [vmem:[%s1455_s10 + $0xe0] sm:$0xff] %v580_v5  ;;  %746 = vst [vmem:[%s1455_s10 + $0x1e0] sm:$0xff] %v676_v6 }
 0x1ec   : > { %715 = vst [vmem:[%s1455_s10 + $0xe8] sm:$0xff] %v582_v9  ;;  %747 = vst [vmem:[%s1455_s10 + $0x1e8] sm:$0xff] %v678_v10  ;;  %v585_v11 = vpop.f32.mrb[30].mxu0  ;;  %v681_v12 = vpop.f32.mrb[30].mxu1 }
 0x1ed   : > { %v586_v13 = vadd.f32 %v585_v11, %v1447_v15  ;;  %v682_v14 = vadd.f32 %v681_v12, %v1447_v15  ;;  %v587_v0 = vpop.f32.mrb[31].mxu0  ;;  %v683_v17 = vpop.f32.mrb[31].mxu1 }
 0x1ee   : > { %v588_v18 = vadd.f32 %v587_v0, %v1449_v16  ;;  %v684_v19 = vadd.f32 %v683_v17, %v1449_v16 }
 0x1ef   : > { %716 = vst [vmem:[%s1455_s10 + $0xf0] sm:$0xff] %v586_v13  ;;  %748 = vst [vmem:[%s1455_s10 + $0x1f0] sm:$0xff] %v682_v14 }
 0x1f0   : > { %717 = vst [vmem:[%s1455_s10 + $0xf8] sm:$0xff] %v588_v18  ;;  %749 = vst [vmem:[%s1455_s10 + $0x1f8] sm:$0xff] %v684_v19 }
 0x1f1   : > { %1088 = shalt.err (!%p1085_p5)
}
 0x1f2   : > { %s1089_s29 = scalar_lea.hbm %s1580_s19, 8192  ;;  %s1093_s20 = scalar_lea.hbm %s1640_s3, 16384 }
 0x1f3   : > { %p1090_p9 = scmp.ne.s32.totalorder %s1580_s19, %s1089_s29  ;;  %p1094_p3 = scmp.lt.u32.totalorder %s1580_s19, %s1640_s3 }
 0x1f4   : > { %p1095_p7 = scmp.lt.u32.totalorder %s1093_s20, %s1089_s29  ;;  %p1097_p4 = scmp.lt.u32.totalorder %s1089_s29, %s1580_s19 }
 0x1f5   : > { %p1091_p1 = pnand %p1090_p9, %p1290_p10 }
 0x1f6   : > { %p1096_p13 = por %p1095_p7, %p1094_p3 }
 0x1f7   : > { %p1092_p2 = pneg %p1091_p1 }
 0x1f8   : > { %p1098_p6 = por %p1097_p4, %p1096_p13 }
 0x1fa   : > { %p1099_p8 = pnand %p1098_p6, %p1092_p2 }
 0x1fc   : > { %1102 = shalt.err (!%p1099_p8)
}
 0x1fd   : > { %s1169_s10 = smov 256   ;;  %s1170_s11 = smov 16  }
 0x1fe   : > { %945 = dma.vmem_to_hbm [thread:$0]  (%p1290_p10), %s1582_s9, 8192, %s1580_s19, %s751_s25, %s1169_s10, %s1169_s10, %s1170_s11  }
 0x1ff PF: > { %s782_s15 = sand.u32 1, %s1141_s12   ;;  %p1658_p12 = scmp.ne.s32.totalorder %s1648_s23, 0 }
 0x200   : > { %p1659_p11 = scmp.ge.s32.totalorder %s1161_s17, 2  ;;  %s783_s18 = scalar_lea.sflag [#allocation4], %s782_s15 }
 0x202   : > { %p956_p0 = pnand %p1659_p11, %p1658_p12 }
 0x204   : > { %1136 = dma.done.wait (!%p956_p0), %s783_s18, 8192  }
 0x205   : > { %1138 = vsyncadd (!%p956_p0), %s783_s18, 4294959104  ;;  %s20_s17 = sadd.s32 1, %s1161_s17   ;;  %s1660_s12 = smov %s1145_s13 }
 0x206   : > { %p17_p5 = scmp.ge.s32.totalorder %s20_s17, 4   ;;  %s1661_s13 = smov %s1149_s14 }
 0x207   : > { %s1662_s14 = smov %s1299_s5  ;;  %s1663_s15 = smov %s1157_s16 }
 0x208   : > { %s1664_s16 = smov %s1666_s28  ;;  %19 = sbr.rel (!%p17_p5) target bundleno = 7 (0x7), region = 81 }
 0x20f   :  { %788 = vsyncpa [#allocation3], 1 }
 0x210   :  { %790 = vsyncpa [#allocation3 + $0x1], 1 }
 0x211   :  { %791 = vsyncpa [#allocation6], 1 }
 0x212   :  { %792 = vsyncpa [#allocation4], 1 }
 0x213   :  { %794 = vsyncpa [#allocation4 + $0x1], 1 }

</bundles_post_ra>
